<compile_context>
chip_gen: v6e
topology: v6e:2x2x1
jax: 0.10.0
libtpu: 0.0.40
codegen_flags: <defaults>
</compile_context>

<pallas_src>
import jax
import jax.numpy as jnp
from jax.experimental import pallas as pl
from jax.experimental.pallas import tpu as pltpu

B = 2          # batch
T = 4          # number of frames in the clip
C = 4          # input channels per frame
H = W = 16     # spatial size
HW = H * W
E = 32         # encoder_output_channels
HID = 32       # LSTM hidden_size (== E so fused weights stack per layer)
N_LAYERS = 2   # LSTM num_layers
NL = 8         # num_labels
N = T * B      # frame*batch rows handled by the hoisted encoder


def stairnet_kernel(x_ref, pool_ref, w_enc_ref, b_enc_ref,
                    w_fused_ref, b_fused_ref,
                    w_d_ref, b_d_ref, w_d2_ref, b_d2_ref,
                    out_ref):
    f32 = jnp.float32

    # ---- encoder, hoisted & batched over all T*B frames --------------------
    # (E, C) @ (C, N*HW) -> (E, N*HW): 1x1 conv with HW in the lane dimension.
    pre = jnp.dot(w_enc_ref[...], x_ref[...], preferred_element_type=f32)
    pre = jnp.maximum(pre + b_enc_ref[...], 0.0)
    # mean pool over HW per (t, b): matmul against block-diagonal pool matrix
    # whose entries already carry the 1/HW factor.  -> (E, N)
    feat_en = jnp.dot(pre, pool_ref[...], preferred_element_type=f32)
    feat = jnp.transpose(feat_en)                       # (N, E)

    # ---- hoist weights + state-independent layer-0 input gates -------------
    w0 = w_fused_ref[0]                                 # (E+HID, 4*HID)
    w_hh0 = w0[E:, :]                                   # (HID, 4*HID)
    xg0 = (jnp.dot(feat, w0[:E, :], preferred_element_type=f32)
           + b_fused_ref[0])                            # (N, 4*HID)
    w_rest = [w_fused_ref[l] for l in range(1, N_LAYERS)]
    b_rest = [b_fused_ref[l] for l in range(1, N_LAYERS)]

    def lstm_cell(gates, c_prev):
        # gates: (B, 4*HID) = one vreg; full-width sigmoid/tanh, then slice.
        sg = jax.nn.sigmoid(gates)
        tg = jnp.tanh(gates)
        i_g = sg[:, 0 * HID:1 * HID]
        f_g = sg[:, 1 * HID:2 * HID]
        g_g = tg[:, 2 * HID:3 * HID]
        o_g = sg[:, 3 * HID:4 * HID]
        c_new = f_g * c_prev + i_g * g_g
        return o_g * jnp.tanh(c_new), c_new

    # hidden = None at the start of the clip -> zero state, carried in vregs.
    h = [jnp.zeros((B, HID), f32) for _ in range(N_LAYERS)]
    c = [jnp.zeros((B, HID), f32) for _ in range(N_LAYERS)]

    # ---- stacked LSTM recurrence, fully unrolled over T (static slices) ----
    for t in range(T):
        g0 = (xg0[t * B:(t + 1) * B, :]
              + jnp.dot(h[0], w_hh0, preferred_element_type=f32))
        h[0], c[0] = lstm_cell(g0, c[0])
        for l in range(1, N_LAYERS):
            xh = jnp.concatenate([h[l - 1], h[l]], axis=-1)     # (B, E+HID)
            gl = (jnp.dot(xh, w_rest[l - 1], preferred_element_type=f32)
                  + b_rest[l - 1])
            h[l], c[l] = lstm_cell(gl, c[l])
    # TODO(synk): nn.LSTM inter-layer dropout is a no-op at inference; not modeled.

    # ---- many_to_one head: decoder -> ReLU -> decoder2 (last frame only) ---
    d = jnp.maximum(jnp.dot(h[-1], w_d_ref[...], preferred_element_type=f32)
                    + b_d_ref[...], 0.0)
    logits = (jnp.dot(d, w_d2_ref[...], preferred_element_type=f32)
              + b_d2_ref[...])
    out_ref[0] = logits


@jax.jit
def stairnet_forward(x, params):
    # x: (B, T, C, H, W) float32, PyTorch layout
    w_enc, b_enc, w_ih, w_hh, b_ih, b_hh, w_d, b_d, w_d2, b_d2 = params

    # lane-dense layout: (C, (t*B + b)*HW + p), HW=256 in the lane dimension.
    xk = jnp.transpose(x, (2, 1, 0, 3, 4)).reshape(C, N * HW).astype(jnp.float32)
    # block-diagonal mean-pool matrix with the 1/HW factor folded in.
    pool = ((jnp.arange(N * HW)[:, None] // HW) ==
            jnp.arange(N)[None, :]).astype(jnp.float32) * (1.0 / HW)   # (N*HW, N)
    w_enc_k = jnp.transpose(w_enc)                   # (E, C)
    b_enc_k = jnp.transpose(b_enc)                   # (E, 1)
    # fuse input/recurrent LSTM weights and biases per layer (host-side).
    w_fused = jnp.concatenate([w_ih, w_hh], axis=1)  # (L, E+HID, 4*HID)
    b_fused = b_ih + b_hh                            # (L, 1, 4*HID)

    vmem = pl.BlockSpec(memory_space=pltpu.MemorySpace.VMEM)
    return pl.pallas_call(
        stairnet_kernel,
        out_shape=jax.ShapeDtypeStruct((1, B, NL), jnp.float32),
        in_specs=[vmem] * 10,
        out_specs=vmem,
        cost_estimate=pl.CostEstimate(flops=2_500_000, transcendentals=5_000,
                                      bytes_accessed=300_000),
    )(xk, pool, w_enc_k, b_enc_k, w_fused, b_fused, w_d, b_d, w_d2, b_d2)


def init_params(key):
    ks = jax.random.split(key, 10)
    s = 0.1
    w_enc = s * jax.random.normal(ks[0], (C, E), jnp.float32)
    b_enc = s * jax.random.normal(ks[1], (1, E), jnp.float32)
    w_ih = s * jax.random.normal(ks[2], (N_LAYERS, E, 4 * HID), jnp.float32)
    w_hh = s * jax.random.normal(ks[3], (N_LAYERS, HID, 4 * HID), jnp.float32)
    b_ih = s * jax.random.normal(ks[4], (N_LAYERS, 1, 4 * HID), jnp.float32)
    b_hh = s * jax.random.normal(ks[5], (N_LAYERS, 1, 4 * HID), jnp.float32)
    w_d = s * jax.random.normal(ks[6], (HID, HID), jnp.float32)
    b_d = s * jax.random.normal(ks[7], (1, HID), jnp.float32)
    w_d2 = s * jax.random.normal(ks[8], (HID, NL), jnp.float32)
    b_d2 = s * jax.random.normal(ks[9], (1, NL), jnp.float32)
    return (w_enc, b_enc, w_ih, w_hh, b_ih, b_hh, w_d, b_d, w_d2, b_d2)


def reference_forward(x, params):
    # Pure-JAX mirror of the PyTorch forward (eval mode, many_to_one=True).
    w_enc, b_enc, w_ih, w_hh, b_ih, b_hh, w_d, b_d, w_d2, b_d2 = params
    h = jnp.zeros((N_LAYERS, B, HID), jnp.float32)
    c = jnp.zeros((N_LAYERS, B, HID), jnp.float32)
    out = None
    for t in range(T):
        frame = jnp.transpose(x[:, t], (0, 2, 3, 1)).reshape(B * HW, C)
        feat = jnp.maximum(frame @ w_enc + b_enc, 0.0).reshape(B, HW, E).mean(axis=1)
        inp = feat
        hs, cs = [], []
        for l in range(N_LAYERS):
            gates = inp @ w_ih[l] + b_ih[l] + h[l] @ w_hh[l] + b_hh[l]
            i_g = jax.nn.sigmoid(gates[:, :HID])
            f_g = jax.nn.sigmoid(gates[:, HID:2 * HID])
            g_g = jnp.tanh(gates[:, 2 * HID:3 * HID])
            o_g = jax.nn.sigmoid(gates[:, 3 * HID:])
            c_new = f_g * c[l] + i_g * g_g
            h_new = o_g * jnp.tanh(c_new)
            hs.append(h_new)
            cs.append(c_new)
            inp = h_new
        h, c = jnp.stack(hs), jnp.stack(cs)
        out = inp
    d = jnp.maximum(out @ w_d + b_d, 0.0)
    return (d @ w_d2 + b_d2)[None]     # (1, B, NL)


if __name__ == "__main__":
    key = jax.random.PRNGKey(0)
    kx, kp = jax.random.split(key)
    x = jax.random.normal(kx, (B, T, C, H, W), jnp.float32)
    params = init_params(kp)

    out = stairnet_forward(x, params)
    jax.block_until_ready(out)

    ref = reference_forward(x, params)
    assert out.shape == (1, B, NL), out.shape
    assert jnp.allclose(out, ref, atol=5e-3, rtol=5e-3), (out, ref)
    print("KERNEL_OK")
</pallas_src>

<mosaic_0001>
module attributes {stable_mosaic.version = 11 : i64} {
  func.func @stairnet_kernel(%arg0: memref<4x2048xf32, #tpu.memory_space<vmem>>, %arg1: memref<2048x8xf32, #tpu.memory_space<vmem>>, %arg2: memref<32x4xf32, #tpu.memory_space<vmem>>, %arg3: memref<32x1xf32, #tpu.memory_space<vmem>>, %arg4: memref<2x64x128xf32, #tpu.memory_space<vmem>>, %arg5: memref<2x1x128xf32, #tpu.memory_space<vmem>>, %arg6: memref<32x32xf32, #tpu.memory_space<vmem>>, %arg7: memref<1x32xf32, #tpu.memory_space<vmem>>, %arg8: memref<32x8xf32, #tpu.memory_space<vmem>>, %arg9: memref<1x8xf32, #tpu.memory_space<vmem>>, %arg10: memref<1x2x8xf32, #tpu.memory_space<vmem>>) attributes {dimension_semantics = [], scalar_prefetch = 0 : i64, scratch_operands = 0 : i64, tpu.core_type = #tpu.core_type<tc>} {
    %c0 = arith.constant 0 : index
    %c0_0 = arith.constant 0 : index
    %0 = vector.load %arg2[%c0, %c0_0] : memref<32x4xf32, #tpu.memory_space<vmem>>, vector<32x4xf32>
    %c0_1 = arith.constant 0 : index
    %c0_2 = arith.constant 0 : index
    %1 = vector.load %arg0[%c0_1, %c0_2] : memref<4x2048xf32, #tpu.memory_space<vmem>>, vector<4x2048xf32>
    %cst = arith.constant dense<0.000000e+00> : vector<32x2048xf32>
    %2 = tpu.matmul %0, %1, %cst {dimension_numbers = #tpu.dot_dimension_numbers<[1], [0], [0], [1], [0, 0, 1, 1], [], []>} : vector<32x4xf32>, vector<4x2048xf32>, vector<32x2048xf32> -> vector<32x2048xf32>
    %c0_3 = arith.constant 0 : index
    %c0_4 = arith.constant 0 : index
    %3 = vector.load %arg3[%c0_3, %c0_4] : memref<32x1xf32, #tpu.memory_space<vmem>>, vector<32x1xf32>
    %4 = vector.broadcast %3 : vector<32x1xf32> to vector<32x2048xf32>
    %5 = arith.addf %2, %4 : vector<32x2048xf32>
    %cst_5 = arith.constant 0.000000e+00 : f32
    %6 = vector.broadcast %cst_5 : f32 to vector<32x2048xf32>
    %7 = arith.maximumf %5, %6 : vector<32x2048xf32>
    %c0_6 = arith.constant 0 : index
    %c0_7 = arith.constant 0 : index
    %8 = vector.load %arg1[%c0_6, %c0_7] : memref<2048x8xf32, #tpu.memory_space<vmem>>, vector<2048x8xf32>
    %cst_8 = arith.constant dense<0.000000e+00> : vector<32x8xf32>
    %9 = tpu.matmul %7, %8, %cst_8 {dimension_numbers = #tpu.dot_dimension_numbers<[1], [0], [0], [1], [0, 0, 1, 1], [], []>} : vector<32x2048xf32>, vector<2048x8xf32>, vector<32x8xf32> -> vector<32x8xf32>
    %10 = tpu.transpose %9, [1, 0] : vector<32x8xf32> -> vector<8x32xf32>
    %c0_9 = arith.constant 0 : index
    %c0_10 = arith.constant 0 : index
    %c0_11 = arith.constant 0 : index
    %11 = vector.load %arg4[%c0_9, %c0_10, %c0_11] : memref<2x64x128xf32, #tpu.memory_space<vmem>>, vector<1x64x128xf32>
    %12 = vector.shape_cast %11 : vector<1x64x128xf32> to vector<64x128xf32>
    %13 = vector.extract_strided_slice %12 {offsets = [32, 0], sizes = [32, 128], strides = [1, 1]} : vector<64x128xf32> to vector<32x128xf32>
    %14 = vector.extract_strided_slice %12 {offsets = [0, 0], sizes = [32, 128], strides = [1, 1]} : vector<64x128xf32> to vector<32x128xf32>
    %cst_12 = arith.constant dense<0.000000e+00> : vector<8x128xf32>
    %15 = tpu.matmul %10, %14, %cst_12 {dimension_numbers = #tpu.dot_dimension_numbers<[1], [0], [0], [1], [0, 0, 1, 1], [], []>} : vector<8x32xf32>, vector<32x128xf32>, vector<8x128xf32> -> vector<8x128xf32>
    %c0_13 = arith.constant 0 : index
    %c0_14 = arith.constant 0 : index
    %c0_15 = arith.constant 0 : index
    %16 = vector.load %arg5[%c0_13, %c0_14, %c0_15] : memref<2x1x128xf32, #tpu.memory_space<vmem>>, vector<1x1x128xf32>
    %17 = vector.shape_cast %16 : vector<1x1x128xf32> to vector<1x128xf32>
    %18 = vector.broadcast %17 : vector<1x128xf32> to vector<8x128xf32>
    %19 = arith.addf %15, %18 : vector<8x128xf32>
    %c1 = arith.constant 1 : index
    %c0_16 = arith.constant 0 : index
    %c0_17 = arith.constant 0 : index
    %20 = vector.load %arg4[%c1, %c0_16, %c0_17] : memref<2x64x128xf32, #tpu.memory_space<vmem>>, vector<1x64x128xf32>
    %21 = vector.shape_cast %20 : vector<1x64x128xf32> to vector<64x128xf32>
    %c1_18 = arith.constant 1 : index
    %c0_19 = arith.constant 0 : index
    %c0_20 = arith.constant 0 : index
    %22 = vector.load %arg5[%c1_18, %c0_19, %c0_20] : memref<2x1x128xf32, #tpu.memory_space<vmem>>, vector<1x1x128xf32>
    %23 = vector.shape_cast %22 : vector<1x1x128xf32> to vector<1x128xf32>
    %cst_21 = arith.constant 0.000000e+00 : f32
    %24 = vector.broadcast %cst_21 : f32 to vector<2x32xf32>
    %cst_22 = arith.constant 0.000000e+00 : f32
    %25 = vector.broadcast %cst_22 : f32 to vector<2x32xf32>
    %cst_23 = arith.constant 0.000000e+00 : f32
    %26 = vector.broadcast %cst_23 : f32 to vector<2x32xf32>
    %cst_24 = arith.constant 0.000000e+00 : f32
    %27 = vector.broadcast %cst_24 : f32 to vector<2x32xf32>
    %28 = vector.extract_strided_slice %19 {offsets = [0, 0], sizes = [2, 128], strides = [1, 1]} : vector<8x128xf32> to vector<2x128xf32>
    %cst_25 = arith.constant dense<0.000000e+00> : vector<2x128xf32>
    %29 = tpu.matmul %24, %13, %cst_25 {dimension_numbers = #tpu.dot_dimension_numbers<[1], [0], [0], [1], [0, 0, 1, 1], [], []>} : vector<2x32xf32>, vector<32x128xf32>, vector<2x128xf32> -> vector<2x128xf32>
    %30 = arith.addf %28, %29 : vector<2x128xf32>
    %31 = arith.negf %30 : vector<2x128xf32>
    %32 = math.exp %31 : vector<2x128xf32>
    %cst_26 = arith.constant 1.000000e+00 : f32
    %33 = vector.broadcast %cst_26 : f32 to vector<2x128xf32>
    %34 = arith.addf %33, %32 : vector<2x128xf32>
    %35 = arith.divf %33, %34 : vector<2x128xf32>
    %36 = math.tanh %30 : vector<2x128xf32>
    %37 = vector.extract_strided_slice %35 {offsets = [0, 0], sizes = [2, 32], strides = [1, 1]} : vector<2x128xf32> to vector<2x32xf32>
    %38 = vector.extract_strided_slice %35 {offsets = [0, 32], sizes = [2, 32], strides = [1, 1]} : vector<2x128xf32> to vector<2x32xf32>
    %39 = vector.extract_strided_slice %36 {offsets = [0, 64], sizes = [2, 32], strides = [1, 1]} : vector<2x128xf32> to vector<2x32xf32>
    %40 = vector.extract_strided_slice %35 {offsets = [0, 96], sizes = [2, 32], strides = [1, 1]} : vector<2x128xf32> to vector<2x32xf32>
    %41 = arith.mulf %38, %26 : vector<2x32xf32>
    %42 = arith.mulf %37, %39 : vector<2x32xf32>
    %43 = arith.addf %41, %42 : vector<2x32xf32>
    %44 = math.tanh %43 : vector<2x32xf32>
    %45 = arith.mulf %40, %44 : vector<2x32xf32>
    %46 = tpu.concatenate %45, %25 in 1 : vector<2x32xf32>, vector<2x32xf32> -> vector<2x64xf32>
    %cst_27 = arith.constant dense<0.000000e+00> : vector<2x128xf32>
    %47 = tpu.matmul %46, %21, %cst_27 {dimension_numbers = #tpu.dot_dimension_numbers<[1], [0], [0], [1], [0, 0, 1, 1], [], []>} : vector<2x64xf32>, vector<64x128xf32>, vector<2x128xf32> -> vector<2x128xf32>
    %48 = vector.broadcast %23 : vector<1x128xf32> to vector<2x128xf32>
    %49 = arith.addf %47, %48 : vector<2x128xf32>
    %50 = arith.negf %49 : vector<2x128xf32>
    %51 = math.exp %50 : vector<2x128xf32>
    %cst_28 = arith.constant 1.000000e+00 : f32
    %52 = vector.broadcast %cst_28 : f32 to vector<2x128xf32>
    %53 = arith.addf %52, %51 : vector<2x128xf32>
    %54 = arith.divf %52, %53 : vector<2x128xf32>
    %55 = math.tanh %49 : vector<2x128xf32>
    %56 = vector.extract_strided_slice %54 {offsets = [0, 0], sizes = [2, 32], strides = [1, 1]} : vector<2x128xf32> to vector<2x32xf32>
    %57 = vector.extract_strided_slice %54 {offsets = [0, 32], sizes = [2, 32], strides = [1, 1]} : vector<2x128xf32> to vector<2x32xf32>
    %58 = vector.extract_strided_slice %55 {offsets = [0, 64], sizes = [2, 32], strides = [1, 1]} : vector<2x128xf32> to vector<2x32xf32>
    %59 = vector.extract_strided_slice %54 {offsets = [0, 96], sizes = [2, 32], strides = [1, 1]} : vector<2x128xf32> to vector<2x32xf32>
    %60 = arith.mulf %57, %27 : vector<2x32xf32>
    %61 = arith.mulf %56, %58 : vector<2x32xf32>
    %62 = arith.addf %60, %61 : vector<2x32xf32>
    %63 = math.tanh %62 : vector<2x32xf32>
    %64 = arith.mulf %59, %63 : vector<2x32xf32>
    %65 = vector.extract_strided_slice %19 {offsets = [2, 0], sizes = [2, 128], strides = [1, 1]} : vector<8x128xf32> to vector<2x128xf32>
    %cst_29 = arith.constant dense<0.000000e+00> : vector<2x128xf32>
    %66 = tpu.matmul %45, %13, %cst_29 {dimension_numbers = #tpu.dot_dimension_numbers<[1], [0], [0], [1], [0, 0, 1, 1], [], []>} : vector<2x32xf32>, vector<32x128xf32>, vector<2x128xf32> -> vector<2x128xf32>
    %67 = arith.addf %65, %66 : vector<2x128xf32>
    %68 = arith.negf %67 : vector<2x128xf32>
    %69 = math.exp %68 : vector<2x128xf32>
    %cst_30 = arith.constant 1.000000e+00 : f32
    %70 = vector.broadcast %cst_30 : f32 to vector<2x128xf32>
    %71 = arith.addf %70, %69 : vector<2x128xf32>
    %72 = arith.divf %70, %71 : vector<2x128xf32>
    %73 = math.tanh %67 : vector<2x128xf32>
    %74 = vector.extract_strided_slice %72 {offsets = [0, 0], sizes = [2, 32], strides = [1, 1]} : vector<2x128xf32> to vector<2x32xf32>
    %75 = vector.extract_strided_slice %72 {offsets = [0, 32], sizes = [2, 32], strides = [1, 1]} : vector<2x128xf32> to vector<2x32xf32>
    %76 = vector.extract_strided_slice %73 {offsets = [0, 64], sizes = [2, 32], strides = [1, 1]} : vector<2x128xf32> to vector<2x32xf32>
    %77 = vector.extract_strided_slice %72 {offsets = [0, 96], sizes = [2, 32], strides = [1, 1]} : vector<2x128xf32> to vector<2x32xf32>
    %78 = arith.mulf %75, %43 : vector<2x32xf32>
    %79 = arith.mulf %74, %76 : vector<2x32xf32>
    %80 = arith.addf %78, %79 : vector<2x32xf32>
    %81 = math.tanh %80 : vector<2x32xf32>
    %82 = arith.mulf %77, %81 : vector<2x32xf32>
    %83 = tpu.concatenate %82, %64 in 1 : vector<2x32xf32>, vector<2x32xf32> -> vector<2x64xf32>
    %cst_31 = arith.constant dense<0.000000e+00> : vector<2x128xf32>
    %84 = tpu.matmul %83, %21, %cst_31 {dimension_numbers = #tpu.dot_dimension_numbers<[1], [0], [0], [1], [0, 0, 1, 1], [], []>} : vector<2x64xf32>, vector<64x128xf32>, vector<2x128xf32> -> vector<2x128xf32>
    %85 = vector.broadcast %23 : vector<1x128xf32> to vector<2x128xf32>
    %86 = arith.addf %84, %85 : vector<2x128xf32>
    %87 = arith.negf %86 : vector<2x128xf32>
    %88 = math.exp %87 : vector<2x128xf32>
    %cst_32 = arith.constant 1.000000e+00 : f32
    %89 = vector.broadcast %cst_32 : f32 to vector<2x128xf32>
    %90 = arith.addf %89, %88 : vector<2x128xf32>
    %91 = arith.divf %89, %90 : vector<2x128xf32>
    %92 = math.tanh %86 : vector<2x128xf32>
    %93 = vector.extract_strided_slice %91 {offsets = [0, 0], sizes = [2, 32], strides = [1, 1]} : vector<2x128xf32> to vector<2x32xf32>
    %94 = vector.extract_strided_slice %91 {offsets = [0, 32], sizes = [2, 32], strides = [1, 1]} : vector<2x128xf32> to vector<2x32xf32>
    %95 = vector.extract_strided_slice %92 {offsets = [0, 64], sizes = [2, 32], strides = [1, 1]} : vector<2x128xf32> to vector<2x32xf32>
    %96 = vector.extract_strided_slice %91 {offsets = [0, 96], sizes = [2, 32], strides = [1, 1]} : vector<2x128xf32> to vector<2x32xf32>
    %97 = arith.mulf %94, %62 : vector<2x32xf32>
    %98 = arith.mulf %93, %95 : vector<2x32xf32>
    %99 = arith.addf %97, %98 : vector<2x32xf32>
    %100 = math.tanh %99 : vector<2x32xf32>
    %101 = arith.mulf %96, %100 : vector<2x32xf32>
    %102 = vector.extract_strided_slice %19 {offsets = [4, 0], sizes = [2, 128], strides = [1, 1]} : vector<8x128xf32> to vector<2x128xf32>
    %cst_33 = arith.constant dense<0.000000e+00> : vector<2x128xf32>
    %103 = tpu.matmul %82, %13, %cst_33 {dimension_numbers = #tpu.dot_dimension_numbers<[1], [0], [0], [1], [0, 0, 1, 1], [], []>} : vector<2x32xf32>, vector<32x128xf32>, vector<2x128xf32> -> vector<2x128xf32>
    %104 = arith.addf %102, %103 : vector<2x128xf32>
    %105 = arith.negf %104 : vector<2x128xf32>
    %106 = math.exp %105 : vector<2x128xf32>
    %cst_34 = arith.constant 1.000000e+00 : f32
    %107 = vector.broadcast %cst_34 : f32 to vector<2x128xf32>
    %108 = arith.addf %107, %106 : vector<2x128xf32>
    %109 = arith.divf %107, %108 : vector<2x128xf32>
    %110 = math.tanh %104 : vector<2x128xf32>
    %111 = vector.extract_strided_slice %109 {offsets = [0, 0], sizes = [2, 32], strides = [1, 1]} : vector<2x128xf32> to vector<2x32xf32>
    %112 = vector.extract_strided_slice %109 {offsets = [0, 32], sizes = [2, 32], strides = [1, 1]} : vector<2x128xf32> to vector<2x32xf32>
    %113 = vector.extract_strided_slice %110 {offsets = [0, 64], sizes = [2, 32], strides = [1, 1]} : vector<2x128xf32> to vector<2x32xf32>
    %114 = vector.extract_strided_slice %109 {offsets = [0, 96], sizes = [2, 32], strides = [1, 1]} : vector<2x128xf32> to vector<2x32xf32>
    %115 = arith.mulf %112, %80 : vector<2x32xf32>
    %116 = arith.mulf %111, %113 : vector<2x32xf32>
    %117 = arith.addf %115, %116 : vector<2x32xf32>
    %118 = math.tanh %117 : vector<2x32xf32>
    %119 = arith.mulf %114, %118 : vector<2x32xf32>
    %120 = tpu.concatenate %119, %101 in 1 : vector<2x32xf32>, vector<2x32xf32> -> vector<2x64xf32>
    %cst_35 = arith.constant dense<0.000000e+00> : vector<2x128xf32>
    %121 = tpu.matmul %120, %21, %cst_35 {dimension_numbers = #tpu.dot_dimension_numbers<[1], [0], [0], [1], [0, 0, 1, 1], [], []>} : vector<2x64xf32>, vector<64x128xf32>, vector<2x128xf32> -> vector<2x128xf32>
    %122 = vector.broadcast %23 : vector<1x128xf32> to vector<2x128xf32>
    %123 = arith.addf %121, %122 : vector<2x128xf32>
    %124 = arith.negf %123 : vector<2x128xf32>
    %125 = math.exp %124 : vector<2x128xf32>
    %cst_36 = arith.constant 1.000000e+00 : f32
    %126 = vector.broadcast %cst_36 : f32 to vector<2x128xf32>
    %127 = arith.addf %126, %125 : vector<2x128xf32>
    %128 = arith.divf %126, %127 : vector<2x128xf32>
    %129 = math.tanh %123 : vector<2x128xf32>
    %130 = vector.extract_strided_slice %128 {offsets = [0, 0], sizes = [2, 32], strides = [1, 1]} : vector<2x128xf32> to vector<2x32xf32>
    %131 = vector.extract_strided_slice %128 {offsets = [0, 32], sizes = [2, 32], strides = [1, 1]} : vector<2x128xf32> to vector<2x32xf32>
    %132 = vector.extract_strided_slice %129 {offsets = [0, 64], sizes = [2, 32], strides = [1, 1]} : vector<2x128xf32> to vector<2x32xf32>
    %133 = vector.extract_strided_slice %128 {offsets = [0, 96], sizes = [2, 32], strides = [1, 1]} : vector<2x128xf32> to vector<2x32xf32>
    %134 = arith.mulf %131, %99 : vector<2x32xf32>
    %135 = arith.mulf %130, %132 : vector<2x32xf32>
    %136 = arith.addf %134, %135 : vector<2x32xf32>
    %137 = math.tanh %136 : vector<2x32xf32>
    %138 = arith.mulf %133, %137 : vector<2x32xf32>
    %139 = vector.extract_strided_slice %19 {offsets = [6, 0], sizes = [2, 128], strides = [1, 1]} : vector<8x128xf32> to vector<2x128xf32>
    %cst_37 = arith.constant dense<0.000000e+00> : vector<2x128xf32>
    %140 = tpu.matmul %119, %13, %cst_37 {dimension_numbers = #tpu.dot_dimension_numbers<[1], [0], [0], [1], [0, 0, 1, 1], [], []>} : vector<2x32xf32>, vector<32x128xf32>, vector<2x128xf32> -> vector<2x128xf32>
    %141 = arith.addf %139, %140 : vector<2x128xf32>
    %142 = arith.negf %141 : vector<2x128xf32>
    %143 = math.exp %142 : vector<2x128xf32>
    %cst_38 = arith.constant 1.000000e+00 : f32
    %144 = vector.broadcast %cst_38 : f32 to vector<2x128xf32>
    %145 = arith.addf %144, %143 : vector<2x128xf32>
    %146 = arith.divf %144, %145 : vector<2x128xf32>
    %147 = math.tanh %141 : vector<2x128xf32>
    %148 = vector.extract_strided_slice %146 {offsets = [0, 0], sizes = [2, 32], strides = [1, 1]} : vector<2x128xf32> to vector<2x32xf32>
    %149 = vector.extract_strided_slice %146 {offsets = [0, 32], sizes = [2, 32], strides = [1, 1]} : vector<2x128xf32> to vector<2x32xf32>
    %150 = vector.extract_strided_slice %147 {offsets = [0, 64], sizes = [2, 32], strides = [1, 1]} : vector<2x128xf32> to vector<2x32xf32>
    %151 = vector.extract_strided_slice %146 {offsets = [0, 96], sizes = [2, 32], strides = [1, 1]} : vector<2x128xf32> to vector<2x32xf32>
    %152 = arith.mulf %149, %117 : vector<2x32xf32>
    %153 = arith.mulf %148, %150 : vector<2x32xf32>
    %154 = arith.addf %152, %153 : vector<2x32xf32>
    %155 = math.tanh %154 : vector<2x32xf32>
    %156 = arith.mulf %151, %155 : vector<2x32xf32>
    %157 = tpu.concatenate %156, %138 in 1 : vector<2x32xf32>, vector<2x32xf32> -> vector<2x64xf32>
    %cst_39 = arith.constant dense<0.000000e+00> : vector<2x128xf32>
    %158 = tpu.matmul %157, %21, %cst_39 {dimension_numbers = #tpu.dot_dimension_numbers<[1], [0], [0], [1], [0, 0, 1, 1], [], []>} : vector<2x64xf32>, vector<64x128xf32>, vector<2x128xf32> -> vector<2x128xf32>
    %159 = vector.broadcast %23 : vector<1x128xf32> to vector<2x128xf32>
    %160 = arith.addf %158, %159 : vector<2x128xf32>
    %161 = arith.negf %160 : vector<2x128xf32>
    %162 = math.exp %161 : vector<2x128xf32>
    %cst_40 = arith.constant 1.000000e+00 : f32
    %163 = vector.broadcast %cst_40 : f32 to vector<2x128xf32>
    %164 = arith.addf %163, %162 : vector<2x128xf32>
    %165 = arith.divf %163, %164 : vector<2x128xf32>
    %166 = math.tanh %160 : vector<2x128xf32>
    %167 = vector.extract_strided_slice %165 {offsets = [0, 0], sizes = [2, 32], strides = [1, 1]} : vector<2x128xf32> to vector<2x32xf32>
    %168 = vector.extract_strided_slice %165 {offsets = [0, 32], sizes = [2, 32], strides = [1, 1]} : vector<2x128xf32> to vector<2x32xf32>
    %169 = vector.extract_strided_slice %166 {offsets = [0, 64], sizes = [2, 32], strides = [1, 1]} : vector<2x128xf32> to vector<2x32xf32>
    %170 = vector.extract_strided_slice %165 {offsets = [0, 96], sizes = [2, 32], strides = [1, 1]} : vector<2x128xf32> to vector<2x32xf32>
    %171 = arith.mulf %168, %136 : vector<2x32xf32>
    %172 = arith.mulf %167, %169 : vector<2x32xf32>
    %173 = arith.addf %171, %172 : vector<2x32xf32>
    %174 = math.tanh %173 : vector<2x32xf32>
    %175 = arith.mulf %170, %174 : vector<2x32xf32>
    %c0_41 = arith.constant 0 : index
    %c0_42 = arith.constant 0 : index
    %176 = vector.load %arg6[%c0_41, %c0_42] : memref<32x32xf32, #tpu.memory_space<vmem>>, vector<32x32xf32>
    %cst_43 = arith.constant dense<0.000000e+00> : vector<2x32xf32>
    %177 = tpu.matmul %175, %176, %cst_43 {dimension_numbers = #tpu.dot_dimension_numbers<[1], [0], [0], [1], [0, 0, 1, 1], [], []>} : vector<2x32xf32>, vector<32x32xf32>, vector<2x32xf32> -> vector<2x32xf32>
    %c0_44 = arith.constant 0 : index
    %c0_45 = arith.constant 0 : index
    %178 = vector.load %arg7[%c0_44, %c0_45] : memref<1x32xf32, #tpu.memory_space<vmem>>, vector<1x32xf32>
    %179 = vector.broadcast %178 : vector<1x32xf32> to vector<2x32xf32>
    %180 = arith.addf %177, %179 : vector<2x32xf32>
    %cst_46 = arith.constant 0.000000e+00 : f32
    %181 = vector.broadcast %cst_46 : f32 to vector<2x32xf32>
    %182 = arith.maximumf %180, %181 : vector<2x32xf32>
    %c0_47 = arith.constant 0 : index
    %c0_48 = arith.constant 0 : index
    %183 = vector.load %arg8[%c0_47, %c0_48] : memref<32x8xf32, #tpu.memory_space<vmem>>, vector<32x8xf32>
    %cst_49 = arith.constant dense<0.000000e+00> : vector<2x8xf32>
    %184 = tpu.matmul %182, %183, %cst_49 {dimension_numbers = #tpu.dot_dimension_numbers<[1], [0], [0], [1], [0, 0, 1, 1], [], []>} : vector<2x32xf32>, vector<32x8xf32>, vector<2x8xf32> -> vector<2x8xf32>
    %c0_50 = arith.constant 0 : index
    %c0_51 = arith.constant 0 : index
    %185 = vector.load %arg9[%c0_50, %c0_51] : memref<1x8xf32, #tpu.memory_space<vmem>>, vector<1x8xf32>
    %186 = vector.broadcast %185 : vector<1x8xf32> to vector<2x8xf32>
    %187 = arith.addf %184, %186 : vector<2x8xf32>
    %c0_52 = arith.constant 0 : index
    %c0_53 = arith.constant 0 : index
    %c0_54 = arith.constant 0 : index
    %188 = vector.load %arg10[%c0_52, %c0_53, %c0_54] : memref<1x2x8xf32, #tpu.memory_space<vmem>>, vector<1x2x8xf32>
    %189 = vector.shape_cast %188 : vector<1x2x8xf32> to vector<2x8xf32>
    %190 = vector.shape_cast %187 : vector<2x8xf32> to vector<1x2x8xf32>
    tpu.vector_store %arg10[%c0_52, %c0_53, %c0_54], %190 {strides = array<i32>} : memref<1x2x8xf32, #tpu.memory_space<vmem>>, vector<1x2x8xf32>,
    return
  }
}

</mosaic_0001>

<bundles_post_ra>
// kernel: stairnet_forward.1
= control target key start
LH: loop header
LB: loop body
LE: loop exit
PB: predicated region body
PF: predicated region fallthrough
CT: control target
= control target key end

     0   :  { %vm101_vm0 = vcmask 1043456   ;;  %v5246_v2 = vmov 0.0   ;;  %vm88_vm1 = vcmask 31744   ;;  %v3771_v9 = vmov 0   ;;  %s5235_s0 = inlined_call_operand.vmem [shape: f32[4,2048], index: 0, kind: input, shape index: {}]   ;;  %s5236_s1 = inlined_call_operand.vmem [shape: f32[2048,8], index: 1, kind: input, shape index: {}]   ;;  %s5237_s2 = inlined_call_operand.vmem [shape: f32[32,4], index: 2, kind: input, shape index: {}]   ;;  %s5238_s3 = inlined_call_operand.vmem [shape: f32[32,1], index: 3, kind: input, shape index: {}]   ;;  %s5239_s4 = inlined_call_operand.vmem [shape: f32[2,64,128], index: 4, kind: input, shape index: {}]   ;;  %s5240_s5 = inlined_call_operand.vmem [shape: f32[2,1,128], index: 5, kind: input, shape index: {}]   ;;  %s5241_s6 = inlined_call_operand.vmem [shape: f32[32,32], index: 6, kind: input, shape index: {}]   ;;  %s5242_s7 = inlined_call_operand.vmem [shape: f32[1,32], index: 7, kind: input, shape index: {}]   ;;  %s5243_s8 = inlined_call_operand.vmem [shape: f32[32,8], index: 8, kind: input, shape index: {}]   ;;  %s5244_s9 = inlined_call_operand.vmem [shape: f32[1,8], index: 9, kind: input, shape index: {}]   ;;  %s5245_s10 = inlined_call_operand.hbm [shape: f32[1,2,8], index: 10, kind: output, shape index: {}]  }
   0x1   :  { %v40_v0 = vld [vmem:[%s5235_s0] sm:$0xff]  ;;  %198 = vmatprep.mubr.f32.mxu0 %v5246_v2  ;;  %216 = vmatprep.mubr.f32.mxu1 %v5246_v2  ;;  %v41_v4 = vld [vmem:[%s5235_s0 + $0x8] sm:$0xff]  ;;  %v3847_v5 = vld [vmem:[%s5237_s2 + $0x18] sm:$0xff] }
   0x2   :  { %v80_v1 = vcombine.high %v40_v0, %v40_v0  ;;  %v3839_v3 = vld [vmem:[%s5237_s2] sm:$0xff]  ;;  %v81_v6 = vcombine.high %v41_v4, %v41_v4  ;;  %v42_v7 = vld [vmem:[%s5235_s0 + $0x10] sm:$0xff]  ;;  %v43_v8 = vld [vmem:[%s5235_s0 + $0x18] sm:$0xff]  ;;  %3675 = vset.pattern.permute.xlu1 %v3771_v9  ;;  %3674 = vset.pattern.permute.xlu0 %v3771_v9 }
   0x3   :  { %v82_v10 = vcombine.high %v42_v7, %v42_v7  ;;  %v83_v11 = vcombine.high %v43_v8, %v43_v8  ;;  %v44_v12 = vld [vmem:[%s5235_s0 + $0x20] sm:$0xff]  ;;  %v45_v13 = vld [vmem:[%s5235_s0 + $0x28] sm:$0xff]  ;;  %v3889_v17 = vld [vmem:[%s5237_s2 + $0x10] sm:$0xff] }
   0x4   :  { %3011 = vmatprep.subr.msk.mxu0 %vm101_vm0, %v80_v1  ;;  %3666 = vmatprep.subr.msk.mxu1 %vm101_vm0, %v80_v1  ;;  %v3874_v14 = vld [vmem:[%s5237_s2 + $0x8] sm:$0xff]  ;;  %v84_v15 = vcombine.high %v44_v12, %v44_v12  ;;  %v85_v16 = vcombine.high %v45_v13, %v45_v13  ;;  %v50_v18 = vld [vmem:[%s5238_s3 + $0x10] sm:$0xff]  ;;  %v48_v19 = vld [vmem:[%s5238_s3] sm:$0xff] }
   0x5   :  { %3012 = vmatpush1.msk.msra.mxu0 %vm101_vm0, %v40_v0  ;;  %3667 = vmatpush1.msk.msra.mxu1 %vm101_vm0, %v40_v0  ;;  %v46_v20 = vld [vmem:[%s5235_s0 + $0x30] sm:$0xff]  ;;  %v51_v22 = vld [vmem:[%s5238_s3 + $0x18] sm:$0xff]  ;;  %v49_v23 = vld [vmem:[%s5238_s3 + $0x8] sm:$0xff] }
   0x6   :  { %3013 = vmatmul.mubr.msk.f32.vlgmr.msra.gmra.mxu0 %vm88_vm1, %v3839_v3  ;;  %3016 = vmatmul.mubr.msk.f32.vlgmr.msra.gmra.mxu1 %vm88_vm1, %v3847_v5  ;;  %v86_v21 = vcombine.high %v46_v20, %v46_v20 }
   0x7   :  { %3017 = vmatprep.subr.msk.mxu1 %vm101_vm0, %v81_v6  ;;  %204 = vmatprep.mubr.f32.mxu0 %v5246_v2 }
   0x8   :  { %3018 = vmatpush1.msk.msra.mxu1 %vm101_vm0, %v41_v4  ;;  %287 = vmatprep.mubr.f32.mxu1 %v5246_v2 }
   0x9   :  { %3023 = vmatprep.subr.msk.mxu0 %vm101_vm0, %v82_v10  ;;  %3029 = vmatprep.subr.msk.mxu1 %vm101_vm0, %v83_v11 }
   0xa   :  { %3014 = vmatmul.mubr.msk.f32.gmra.mxu0 %vm88_vm1, %v3874_v14  ;;  %3019 = vmatmul.mubr.msk.f32.vlgmr.msra.gmra.mxu1 %vm88_vm1, %v3839_v3 }
   0xb   :  { %210 = vmatprep.mubr.f32.mxu0 %v5246_v2  ;;  %293 = vmatprep.mubr.f32.mxu1 %v5246_v2 }
   0xc   :  { %3024 = vmatpush1.msk.msra.mxu0 %vm101_vm0, %v42_v7  ;;  %3030 = vmatpush1.msk.msra.mxu1 %vm101_vm0, %v43_v8 }
   0xd   :  { %3035 = vmatprep.subr.msk.mxu0 %vm101_vm0, %v84_v15  ;;  %3041 = vmatprep.subr.msk.mxu1 %vm101_vm0, %v85_v16 }
   0xe   :  { %3015 = vmatmul.mubr.msk.f32.gmra.mxu0 %vm88_vm1, %v3889_v17  ;;  %3020 = vmatmul.mubr.msk.f32.gmra.mxu1 %vm88_vm1, %v3874_v14 }
   0xf   :  { %299 = vmatprep.mubr.f32.mxu1 %v5246_v2  ;;  %376 = vmatprep.mubr.f32.mxu0 %v5246_v2 }
  0x10   :  { %64 = vperm.xlu1 %3675, %v50_v18   ;;  %54 = vperm.xlu0 %3674, %v48_v19  }
  0x12   :  { %3021 = vmatmul.mubr.msk.f32.gmra.mxu1 %vm88_vm1, %v3889_v17  ;;  %3025 = vmatmul.mubr.msk.f32.vlgmr.msra.gmra.mxu0 %vm88_vm1, %v3839_v3 }
  0x13   :  { %305 = vmatprep.mubr.f32.mxu1 %v5246_v2  ;;  %382 = vmatprep.mubr.f32.mxu0 %v5246_v2 }
  0x14   :  { %3036 = vmatpush1.msk.msra.mxu0 %vm101_vm0, %v44_v12  ;;  %69 = vperm.xlu1 %3675, %v51_v22  }
  0x15   :  { %3047 = vmatprep.subr.msk.mxu0 %vm101_vm0, %v86_v21  ;;  %59 = vperm.xlu0 %3674, %v49_v23  }
  0x16   :  { %15 = vsyncpa [#allocation3], 0  ;;  %3022 = vmatmul.mubr.msk.f32.gmra.mxu1 %vm88_vm1, %v3847_v5  ;;  %3026 = vmatmul.mubr.msk.f32.gmra.mxu0 %vm88_vm1, %v3874_v14  ;;  %v47_v24 = vld [vmem:[%s5235_s0 + $0x38] sm:$0xff]  ;;  %v940_v29 = vld [vmem:[%s5236_s1 + $0xf0] sm:$0xff]  ;;  %vm3772_vm2 = vmmov 0   ;;  %vm1893_vm3 = vcmask 261120  }
  0x17   :  { %388 = vmatprep.mubr.f32.mxu0 %v5246_v2  ;;  %465 = vmatprep.mubr.f32.mxu1 %v5246_v2  ;;  %v87_v25 = vcombine.high %v47_v24, %v47_v24  ;;  %v941_v26 = vld [vmem:[%s5236_s1 + $0xf8] sm:$0xff]  ;;  %v924_v30 = vld [vmem:[%s5236_s1 + $0x70] sm:$0xff]  ;;  %v939_v31 = vld [vmem:[%s5236_s1 + $0xe8] sm:$0xff]  ;;  %s3773_s0 = smov 64   ;;  %s3774_s3 = smov 32   ;;  %vm2087_vm4 = vcmask 523264  }
  0x18   :  { %v973_v27 = vld [vmem:[%s5236_s1 + $0x1f8] sm:$0xff]  ;;  %v923_v32 = vld [vmem:[%s5236_s1 + $0x68] sm:$0xff]  ;;  %v938_v34 = vld [vmem:[%s5236_s1 + $0xe0] sm:$0xff]  ;;  %s3775_s14 = smov [#allocation2]   ;;  %vm2995_vm5 = vcmask 58368  }
  0x19   :  { %v925_v28 = vld [vmem:[%s5236_s1 + $0x78] sm:$0xff]  ;;  %v972_v35 = vld [vmem:[%s5236_s1 + $0x1f0] sm:$0xff]  ;;  %v922_v36 = vld [vmem:[%s5236_s1 + $0x60] sm:$0xff]  ;;  %s3003_s15 = sshll.u32 %s3775_s14, 4  ;;  %s3004_s15 = int_to_ptr.vmem [resolvable:$true] %s3003_s15 }
  0x1a   :  { %3027 = vmatmul.mubr.msk.f32.gmra.mxu0 %vm88_vm1, %v3889_v17  ;;  %3031 = vmatmul.mubr.msk.f32.vlgmr.msra.gmra.mxu1 %vm88_vm1, %v3839_v3  ;;  %v957_v33 = vld [vmem:[%s5236_s1 + $0x178] sm:$0xff]  ;;  %v956_v37 = vld [vmem:[%s5236_s1 + $0x170] sm:$0xff]  ;;  %v971_v39 = vld [vmem:[%s5236_s1 + $0x1e8] sm:$0xff]  ;;  %p3753_p1 = scmp.lt.s32.totalorder %s3004_s15, %s3004_s15 }
  0x1b   :  { %394 = vmatprep.mubr.f32.mxu0 %v5246_v2  ;;  %471 = vmatprep.mubr.f32.mxu1 %v5246_v2  ;;  %v937_v38 = vld [vmem:[%s5236_s1 + $0xd8] sm:$0xff]  ;;  %v936_v41 = vld [vmem:[%s5236_s1 + $0xd0] sm:$0xff]  ;;  %v955_v42 = vld [vmem:[%s5236_s1 + $0x168] sm:$0xff] }
  0x1c   :  { %3042 = vmatpush1.msk.msra.mxu1 %vm101_vm0, %v45_v13  ;;  %v921_v40 = vld [vmem:[%s5236_s1 + $0x58] sm:$0xff]  ;;  %v970_v43 = vld [vmem:[%s5236_s1 + $0x1e0] sm:$0xff]  ;;  %v920_v44 = vld [vmem:[%s5236_s1 + $0x50] sm:$0xff] }
  0x1d   :  { %3053 = vmatprep.subr.msk.mxu1 %vm101_vm0, %v87_v25  ;;  %v954_v45 = vld [vmem:[%s5236_s1 + $0x160] sm:$0xff]  ;;  %v935_v46 = vld [vmem:[%s5236_s1 + $0xc8] sm:$0xff]  ;;  %v969_v47 = vld [vmem:[%s5236_s1 + $0x1d8] sm:$0xff] }
  0x1e   :  { %3028 = vmatmul.mubr.msk.f32.gmra.mxu0 %vm88_vm1, %v3847_v5  ;;  %3032 = vmatmul.mubr.msk.f32.gmra.mxu1 %vm88_vm1, %v3874_v14  ;;  %v919_v48 = vld [vmem:[%s5236_s1 + $0x48] sm:$0xff]  ;;  %v953_v49 = vld [vmem:[%s5236_s1 + $0x158] sm:$0xff]  ;;  %v934_v50 = vld [vmem:[%s5236_s1 + $0xc0] sm:$0xff] }
  0x1f   :  { %477 = vmatprep.mubr.f32.mxu1 %v5246_v2  ;;  %554 = vmatprep.mubr.f32.mxu0 %v5246_v2  ;;  %v968_v51 = vld [vmem:[%s5236_s1 + $0x1d0] sm:$0xff]  ;;  %v918_v52 = vld [vmem:[%s5236_s1 + $0x40] sm:$0xff]  ;;  %v933_v54 = vld [vmem:[%s5236_s1 + $0xb8] sm:$0xff] }
  0x20   :  { %v952_v53 = vld [vmem:[%s5236_s1 + $0x150] sm:$0xff]  ;;  %v967_v55 = vld [vmem:[%s5236_s1 + $0x1c8] sm:$0xff]  ;;  %v917_v56 = vld [vmem:[%s5236_s1 + $0x38] sm:$0xff] }
  0x21   :  { %v951_v57 = vld [vmem:[%s5236_s1 + $0x148] sm:$0xff]  ;;  %v932_v58 = vld [vmem:[%s5236_s1 + $0xb0] sm:$0xff]  ;;  %v966_v59 = vld [vmem:[%s5236_s1 + $0x1c0] sm:$0xff] }
  0x22   :  { %3033 = vmatmul.mubr.msk.f32.gmra.mxu1 %vm88_vm1, %v3889_v17  ;;  %3037 = vmatmul.mubr.msk.f32.vlgmr.msra.gmra.mxu0 %vm88_vm1, %v3839_v3  ;;  %v916_v60 = vld [vmem:[%s5236_s1 + $0x30] sm:$0xff]  ;;  %v950_v61 = vld [vmem:[%s5236_s1 + $0x140] sm:$0xff]  ;;  %v931_v62 = vld [vmem:[%s5236_s1 + $0xa8] sm:$0xff] }
  0x23   :  { %483 = vmatprep.mubr.f32.mxu1 %v5246_v2  ;;  %560 = vmatprep.mubr.f32.mxu0 %v5246_v2  ;;  %v965_v63 = vld [vmem:[%s5236_s1 + $0x1b8] sm:$0xff]  ;;  %v915_v0 = vld [vmem:[%s5236_s1 + $0x28] sm:$0xff]  ;;  %v964_v4 = vld [vmem:[%s5236_s1 + $0x1b0] sm:$0xff] }
  0x24   :  { %3048 = vmatpush1.msk.msra.mxu0 %vm101_vm0, %v46_v20  ;;  %v949_v1 = vld [vmem:[%s5236_s1 + $0x138] sm:$0xff]  ;;  %v948_v6 = vld [vmem:[%s5236_s1 + $0x130] sm:$0xff]  ;;  %v963_v8 = vld [vmem:[%s5236_s1 + $0x1a8] sm:$0xff] }
  0x25   :  { %3090 = vmatprep.subr.mxu0 %v941_v26  ;;  %v929_v7 = vld [vmem:[%s5236_s1 + $0x98] sm:$0xff]  ;;  %v947_v10 = vld [vmem:[%s5236_s1 + $0x128] sm:$0xff]  ;;  %v928_v11 = vld [vmem:[%s5236_s1 + $0x90] sm:$0xff] }
  0x26   :  { %3034 = vmatmul.mubr.msk.f32.gmra.mxu1 %vm88_vm1, %v3847_v5  ;;  %3038 = vmatmul.mubr.msk.f32.gmra.mxu0 %vm88_vm1, %v3874_v14  ;;  %v913_v9 = vld [vmem:[%s5236_s1 + $0x18] sm:$0xff]  ;;  %v962_v12 = vld [vmem:[%s5236_s1 + $0x1a0] sm:$0xff]  ;;  %v912_v13 = vld [vmem:[%s5236_s1 + $0x10] sm:$0xff] }
  0x27   :  { %566 = vmatprep.mubr.f32.mxu0 %v5246_v2  ;;  %643 = vmatprep.mubr.f32.mxu1 %v5246_v2  ;;  %v927_v15 = vld [vmem:[%s5236_s1 + $0x88] sm:$0xff]  ;;  %v961_v16 = vld [vmem:[%s5236_s1 + $0x198] sm:$0xff]  ;;  %v926_v19 = vld [vmem:[%s5236_s1 + $0x80] sm:$0xff] }
  0x28   :  { %v945_v18 = vld [vmem:[%s5236_s1 + $0x118] sm:$0xff]  ;;  %v960_v20 = vld [vmem:[%s5236_s1 + $0x190] sm:$0xff]  ;;  %v910_v21 = vld [vmem:[%s5236_s1] sm:$0xff] }
  0x29   :  { %v944_v22 = vld [vmem:[%s5236_s1 + $0x110] sm:$0xff]  ;;  %v959_v23 = vld [vmem:[%s5236_s1 + $0x188] sm:$0xff]  ;;  %v958_v26 = vld [vmem:[%s5236_s1 + $0x180] sm:$0xff] }
  0x2a   :  { %3039 = vmatmul.mubr.msk.f32.gmra.mxu0 %vm88_vm1, %v3889_v17  ;;  %3043 = vmatmul.mubr.msk.f32.vlgmr.msra.gmra.mxu1 %vm88_vm1, %v3839_v3  ;;  %v943_v25 = vld [vmem:[%s5236_s1 + $0x108] sm:$0xff] }
  0x2b   :  { %572 = vmatprep.mubr.f32.mxu0 %v5246_v2  ;;  %649 = vmatprep.mubr.f32.mxu1 %v5246_v2 }
  0x2c   :  { %3054 = vmatpush1.msk.msra.mxu1 %vm101_vm0, %v47_v24  ;;  %v1005_v24 = vld [vmem:[%s5236_s1 + $0x2f8] sm:$0xff] }
  0x2d   :  { %3134 = vmatprep.subr.mxu1 %v973_v27  ;;  %v942_v27 = vld [vmem:[%s5236_s1 + $0x100] sm:$0xff] }
  0x2e   :  { %3040 = vmatmul.mubr.msk.f32.gmra.mxu0 %vm88_vm1, %v3847_v5  ;;  %3044 = vmatmul.mubr.msk.f32.gmra.mxu1 %vm88_vm1, %v3874_v14 }
  0x2f   :  { %655 = vmatprep.mubr.f32.mxu1 %v5246_v2  ;;  %732 = vmatprep.mubr.f32.mxu0 %v5246_v2 }
  0x32   :  { %3045 = vmatmul.mubr.msk.f32.gmra.mxu1 %vm88_vm1, %v3889_v17  ;;  %3049 = vmatmul.mubr.msk.f32.vlgmr.msra.gmra.mxu0 %vm88_vm1, %v3839_v3 }
  0x33   :  { %661 = vmatprep.mubr.f32.mxu1 %v5246_v2  ;;  %738 = vmatprep.mubr.f32.mxu0 %v5246_v2 }
  0x34   :  { %3091 = vmatpush3.msra.mxu0 %v925_v28  ;;  %v1037_v28 = vld [vmem:[%s5236_s1 + $0x3f8] sm:$0xff] }
  0x35   :  { %3092 = vmatprep.subr.mxu0 %v940_v29 }
  0x36   :  { %3046 = vmatmul.mubr.msk.f32.gmra.mxu1 %vm88_vm1, %v3847_v5  ;;  %3050 = vmatmul.mubr.msk.f32.gmra.mxu0 %vm88_vm1, %v3874_v14 }
  0x37   :  { %744 = vmatprep.mubr.f32.mxu0 %v5246_v2  ;;  %821 = vmatprep.mubr.f32.mxu1 %v5246_v2 }
  0x38   :  { %3093 = vmatpush3.msra.mxu0 %v924_v30 }
  0x39   :  { %3094 = vmatprep.subr.mxu0 %v939_v31 }
  0x3a   :  { %3051 = vmatmul.mubr.msk.f32.gmra.mxu0 %vm88_vm1, %v3889_v17  ;;  %3055 = vmatmul.mubr.msk.f32.vlgmr.msra.gmra.mxu1 %vm88_vm1, %v3839_v3  ;;  %v930_v3 = vld [vmem:[%s5236_s1 + $0xa0] sm:$0xff] }
  0x3b   :  { %750 = vmatprep.mubr.f32.mxu0 %v5246_v2  ;;  %827 = vmatprep.mubr.f32.mxu1 %v5246_v2 }
  0x3c   :  { %3095 = vmatpush3.msra.mxu0 %v923_v32  ;;  %3135 = vmatpush3.msra.mxu1 %v957_v33 }
  0x3d   :  { %3096 = vmatprep.subr.mxu0 %v938_v34  ;;  %3136 = vmatprep.subr.mxu1 %v972_v35 }
  0x3e   :  { %3052 = vmatmul.mubr.msk.f32.gmra.mxu0 %vm88_vm1, %v3847_v5  ;;  %3056 = vmatmul.mubr.msk.f32.gmra.mxu1 %vm88_vm1, %v3874_v14  ;;  %v946_v14 = vld [vmem:[%s5236_s1 + $0x120] sm:$0xff] }
  0x3f   :  { %833 = vmatprep.mubr.f32.mxu1 %v5246_v2  ;;  %3097 = vmatpush3.msra.mxu0 %v922_v36 }
  0x40   :  { %3137 = vmatpush3.msra.mxu1 %v956_v37  ;;  %3098 = vmatprep.subr.mxu0 %v937_v38 }
  0x41   :  { %3138 = vmatprep.subr.mxu1 %v971_v39  ;;  %3099 = vmatpush3.msra.mxu0 %v921_v40 }
  0x42   :  { %3057 = vmatmul.mubr.msk.f32.gmra.mxu1 %vm88_vm1, %v3889_v17  ;;  %3100 = vmatprep.subr.mxu0 %v936_v41  ;;  %v911_v17 = vld [vmem:[%s5236_s1 + $0x8] sm:$0xff] }
  0x43   :  { %839 = vmatprep.mubr.f32.mxu1 %v5246_v2  ;;  %3139 = vmatpush3.msra.mxu1 %v955_v42 }
  0x44   :  { %3140 = vmatprep.subr.mxu1 %v970_v43  ;;  %3101 = vmatpush3.msra.mxu0 %v920_v44  ;;  %v989_v44 = vld [vmem:[%s5236_s1 + $0x278] sm:$0xff] }
  0x45   :  { %3141 = vmatpush3.msra.mxu1 %v954_v45  ;;  %3102 = vmatprep.subr.mxu0 %v935_v46 }
  0x46   :  { %3058 = vmatmul.mubr.msk.f32.gmra.mxu1 %vm88_vm1, %v3847_v5  ;;  %3142 = vmatprep.subr.mxu1 %v969_v47  ;;  %v914_v5 = vld [vmem:[%s5236_s1 + $0x20] sm:$0xff] }
  0x47   :  { %3103 = vmatpush3.msra.mxu0 %v919_v48  ;;  %3143 = vmatpush3.msra.mxu1 %v953_v49  ;;  %v1004_v48 = vld [vmem:[%s5236_s1 + $0x2f0] sm:$0xff] }
  0x48   :  { %3104 = vmatprep.subr.mxu0 %v934_v50  ;;  %3144 = vmatprep.subr.mxu1 %v968_v51 }
  0x49   :  { %3105 = vmatpush3.msra.mxu0 %v918_v52  ;;  %3145 = vmatpush3.msra.mxu1 %v952_v53  ;;  %v988_v52 = vld [vmem:[%s5236_s1 + $0x270] sm:$0xff] }
  0x4a   :  { %3106 = vmatprep.subr.mxu0 %v933_v54  ;;  %3146 = vmatprep.subr.mxu1 %v967_v55  ;;  %v1003_v55 = vld [vmem:[%s5236_s1 + $0x2e8] sm:$0xff] }
  0x4b   :  { %3107 = vmatpush3.msra.mxu0 %v917_v56  ;;  %3147 = vmatpush3.msra.mxu1 %v951_v57 }
  0x4c   :  { %3108 = vmatprep.subr.mxu0 %v932_v58  ;;  %3148 = vmatprep.subr.mxu1 %v966_v59 }
  0x4d   :  { %3109 = vmatpush3.msra.mxu0 %v916_v60  ;;  %3149 = vmatpush3.msra.mxu1 %v950_v61 }
  0x4e   :  { %3110 = vmatprep.subr.mxu0 %v931_v62  ;;  %3150 = vmatprep.subr.mxu1 %v965_v63  ;;  %v987_v63 = vld [vmem:[%s5236_s1 + $0x268] sm:$0xff] }
  0x4f   :  { %3111 = vmatpush3.msra.mxu0 %v915_v0  ;;  %3151 = vmatpush3.msra.mxu1 %v949_v1  ;;  %v1021_v0 = vld [vmem:[%s5236_s1 + $0x378] sm:$0xff] }
  0x50   :  { %3112 = vmatprep.subr.mxu0 %v930_v3  ;;  %3152 = vmatprep.subr.mxu1 %v964_v4  ;;  %v1002_v3 = vld [vmem:[%s5236_s1 + $0x2e0] sm:$0xff]  ;;  %v1036_v4 = vld [vmem:[%s5236_s1 + $0x3f0] sm:$0xff] }
  0x51   :  { %3113 = vmatpush3.msra.mxu0 %v914_v5  ;;  %3153 = vmatpush3.msra.mxu1 %v948_v6 }
  0x52   :  { %3114 = vmatprep.subr.mxu0 %v929_v7  ;;  %3154 = vmatprep.subr.mxu1 %v963_v8 }
  0x53   :  { %3115 = vmatpush3.msra.mxu0 %v913_v9  ;;  %3155 = vmatpush3.msra.mxu1 %v947_v10  ;;  %v986_v9 = vld [vmem:[%s5236_s1 + $0x260] sm:$0xff]  ;;  %v1020_v10 = vld [vmem:[%s5236_s1 + $0x370] sm:$0xff] }
  0x54   :  { %3116 = vmatprep.subr.mxu0 %v928_v11  ;;  %3156 = vmatprep.subr.mxu1 %v962_v12 }
  0x55   :  { %3117 = vmatpush3.msra.mxu0 %v912_v13  ;;  %3157 = vmatpush3.msra.mxu1 %v946_v14 }
  0x56   :  { %3118 = vmatprep.subr.mxu0 %v927_v15  ;;  %3158 = vmatprep.subr.mxu1 %v961_v16  ;;  %v1001_v16 = vld [vmem:[%s5236_s1 + $0x2d8] sm:$0xff] }
  0x57   :  { %3119 = vmatpush3.msra.mxu0 %v911_v17  ;;  %3159 = vmatpush3.msra.mxu1 %v945_v18  ;;  %v1035_v17 = vld [vmem:[%s5236_s1 + $0x3e8] sm:$0xff] }
  0x58   :  { %3120 = vmatprep.subr.mxu0 %v926_v19  ;;  %3160 = vmatprep.subr.mxu1 %v960_v20 }
  0x59   :  { %3121 = vmatpush3.msra.mxu0 %v910_v21  ;;  %3161 = vmatpush3.msra.mxu1 %v944_v22  ;;  %v985_v21 = vld [vmem:[%s5236_s1 + $0x258] sm:$0xff]  ;;  %v1019_v22 = vld [vmem:[%s5236_s1 + $0x368] sm:$0xff] }
  0x5a   :  { %3162 = vmatprep.subr.mxu1 %v959_v23  ;;  %3178 = vmatprep.subr.mxu0 %v1005_v24  ;;  %v1000_v24 = vld [vmem:[%s5236_s1 + $0x2d0] sm:$0xff] }
  0x5b   :  { %3163 = vmatpush3.msra.mxu1 %v943_v25 }
  0x5c   :  { %3164 = vmatprep.subr.mxu1 %v958_v26 }
  0x5d   :  { %3165 = vmatpush3.msra.mxu1 %v942_v27 }
  0x5e   :  { %3222 = vmatprep.subr.mxu1 %v1037_v28  ;;  %v1034_v28 = vld [vmem:[%s5236_s1 + $0x3e0] sm:$0xff] }
  0x8b   :  { %v4199_v29 = vpop.permute.xlu0 %54  ;;  %v4211_v45 = vpop.permute.xlu1 %64 }
  0x8f   :  { %v4240_v5 = vpop.permute.xlu1 %69 }
  0x90   :  { %v4205_v36 = vpop.permute.xlu0 %59 }
  0xc6   :  { %v200_v30 = vpop.f32.mrf.mxu0  ;;  %v4201_v31 = vpop.f32.mrf.mxu1 }
  0xc7   :  { %v201_v32 = vadd.f32 %v200_v30, %v4199_v29  ;;  %v984_v30 = vld [vmem:[%s5236_s1 + $0x250] sm:$0xff] }
  0xc8   :  { %v202_v33 = vpop.f32.mrf.mxu0  ;;  %v220_v34 = vpop.f32.mrf.mxu1 }
  0xc9   :  { %v203_v35 = vadd.f32 %v202_v33, %v4199_v29  ;;  %v846_v39 = vmax.f32 %v201_v32, 0.0  ;;  %v221_v13 = vadd.f32 %v220_v34, %v4240_v5  ;;  %v219_v32 = vadd.f32 %v4201_v31, %v4240_v5  ;;  %v1018_v33 = vld [vmem:[%s5236_s1 + $0x360] sm:$0xff]  ;;  %v1033_v31 = vld [vmem:[%s5236_s1 + $0x3d8] sm:$0xff] }
  0xca   :  { %v206_v37 = vpop.f32.mrf.mxu0  ;;  %v289_v38 = vpop.f32.mrf.mxu1 }
  0xcb   :  { %v847_v40 = vmax.f32 %v203_v35, 0.0  ;;  %v290_v41 = vadd.f32 %v289_v38, %v4199_v29  ;;  %v207_v49 = vadd.f32 %v206_v37, %v4205_v36  ;;  %v895_v26 = vmax.f32 %v221_v13, 0.0  ;;  %v993_v13 = vld [vmem:[%s5236_s1 + $0x298] sm:$0xff] }
  0xcc   :  { %v208_v42 = vpop.f32.mrf.mxu0  ;;  %v291_v43 = vpop.f32.mrf.mxu1 }
  0xcd   :  { %v209_v46 = vadd.f32 %v208_v42, %v4205_v36  ;;  %v292_v47 = vadd.f32 %v291_v43, %v4199_v29  ;;  %1230 = vmatprep.mubr.f32.mxu0 %v847_v40  ;;  %v848_v56 = vmax.f32 %v290_v41, 0.0  ;;  %v862_v62 = vmax.f32 %v207_v49, 0.0  ;;  %v983_v42 = vld [vmem:[%s5236_s1 + $0x248] sm:$0xff]  ;;  %v1017_v43 = vld [vmem:[%s5236_s1 + $0x358] sm:$0xff]  ;;  %v1032_v49 = vld [vmem:[%s5236_s1 + $0x3d0] sm:$0xff] }
  0xce   :  { %v212_v50 = vpop.f32.mrf.mxu0  ;;  %v295_v51 = vpop.f32.mrf.mxu1  ;;  %1231 = vmatmul.mubr.f32.vlgmr.msra.gmra.mxu0 %v846_v39  ;;  %v999_v39 = vld [vmem:[%s5236_s1 + $0x2c8] sm:$0xff]  ;;  %v894_v41 = vmax.f32 %v219_v32, 0.0  ;;  %v990_v32 = vld [vmem:[%s5236_s1 + $0x280] sm:$0xff] }
  0xcf   :  { %v863_v53 = vmax.f32 %v209_v46, 0.0  ;;  %v849_v54 = vmax.f32 %v292_v47, 0.0  ;;  %3179 = vmatpush3.msra.mxu0 %v989_v44  ;;  %v213_v59 = vadd.f32 %v212_v50, %v4211_v45  ;;  %v296_v6 = vadd.f32 %v295_v51, %v4205_v36  ;;  %v998_v44 = vld [vmem:[%s5236_s1 + $0x2c0] sm:$0xff]  ;;  %v1016_v51 = vld [vmem:[%s5236_s1 + $0x350] sm:$0xff] }
  0xd0   :  { %3180 = vmatprep.subr.mxu0 %v1004_v48  ;;  %v214_v57 = vpop.f32.mrf.mxu0  ;;  %v297_v58 = vpop.f32.mrf.mxu1  ;;  %v982_v50 = vld [vmem:[%s5236_s1 + $0x240] sm:$0xff] }
  0xd1   :  { %v215_v60 = vadd.f32 %v214_v57, %v4211_v45  ;;  %v298_v61 = vadd.f32 %v297_v58, %v4205_v36  ;;  %3181 = vmatpush3.msra.mxu0 %v988_v52  ;;  %1235 = vmatprep.mubr.f32.mxu0 %v863_v53  ;;  %v878_v14 = vmax.f32 %v213_v59, 0.0  ;;  %v864_v19 = vmax.f32 %v296_v6, 0.0  ;;  %v1015_v57 = vld [vmem:[%s5236_s1 + $0x348] sm:$0xff]  ;;  %v996_v58 = vld [vmem:[%s5236_s1 + $0x2b0] sm:$0xff] }
  0xd2   :  { %1315 = vmatprep.mubr.f32.mxu1 %v849_v54  ;;  %3182 = vmatprep.subr.mxu0 %v1003_v55  ;;  %v301_v1 = vpop.f32.mrf.mxu1  ;;  %v4249_v11 = vpop.f32.mrf.mxu0  ;;  %v997_v54 = vld [vmem:[%s5236_s1 + $0x2b8] sm:$0xff]  ;;  %v1031_v55 = vld [vmem:[%s5236_s1 + $0x3c8] sm:$0xff] }
  0xd3   :  { %v879_v7 = vmax.f32 %v215_v60, 0.0  ;;  %v865_v8 = vmax.f32 %v298_v61, 0.0  ;;  %1236 = vmatmul.mubr.f32.gmra.mxu0 %v862_v62  ;;  %1316 = vmatmul.mubr.f32.vlgmr.msra.gmra.mxu1 %v848_v56  ;;  %v302_v20 = vadd.f32 %v301_v1, %v4211_v45  ;;  %v981_v56 = vld [vmem:[%s5236_s1 + $0x238] sm:$0xff]  ;;  %v1030_v60 = vld [vmem:[%s5236_s1 + $0x3c0] sm:$0xff]  ;;  %v980_v61 = vld [vmem:[%s5236_s1 + $0x230] sm:$0xff] }
  0xd4   :  { %3183 = vmatpush3.msra.mxu0 %v987_v63  ;;  %3223 = vmatpush3.msra.mxu1 %v1021_v0  ;;  %v303_v12 = vpop.f32.mrf.mxu1  ;;  %v380_v23 = vpop.f32.mrf.mxu0  ;;  %v1014_v63 = vld [vmem:[%s5236_s1 + $0x340] sm:$0xff]  ;;  %v995_v0 = vld [vmem:[%s5236_s1 + $0x2a8] sm:$0xff]  ;;  %v1029_v1 = vld [vmem:[%s5236_s1 + $0x3b8] sm:$0xff] }
  0xd5   :  { %3184 = vmatprep.subr.mxu0 %v1002_v3  ;;  %3224 = vmatprep.subr.mxu1 %v1036_v4  ;;  %v304_v15 = vadd.f32 %v303_v12, %v4211_v45  ;;  %v880_v35 = vmax.f32 %v302_v20, 0.0  ;;  %v381_v37 = vadd.f32 %v380_v23, %v4199_v29  ;;  %v979_v3 = vld [vmem:[%s5236_s1 + $0x228] sm:$0xff]  ;;  %v1013_v4 = vld [vmem:[%s5236_s1 + $0x338] sm:$0xff]  ;;  %v1012_v12 = vld [vmem:[%s5236_s1 + $0x330] sm:$0xff] }
  0xd6   :  { %3185 = vmatpush3.msra.mxu0 %v986_v9  ;;  %3225 = vmatpush3.msra.mxu1 %v1020_v10  ;;  %v307_v18 = vpop.f32.mrf.mxu1  ;;  %v4325_v59 = vpop.f32.mrf.mxu0  ;;  %v978_v10 = vld [vmem:[%s5236_s1 + $0x220] sm:$0xff]  ;;  %v991_v23 = vld [vmem:[%s5236_s1 + $0x288] sm:$0xff] }
  0xd7   :  { %1240 = vmatprep.mubr.f32.mxu0 %v879_v7  ;;  %1320 = vmatprep.mubr.f32.mxu1 %v865_v8  ;;  %v881_v27 = vmax.f32 %v304_v15, 0.0  ;;  %v308_v40 = vadd.f32 %v307_v18, %v4240_v5  ;;  %v851_v47 = vmax.f32 %v381_v37, 0.0  ;;  %v994_v7 = vld [vmem:[%s5236_s1 + $0x2a0] sm:$0xff]  ;;  %v1028_v8 = vld [vmem:[%s5236_s1 + $0x3b0] sm:$0xff]  ;;  %v977_v15 = vld [vmem:[%s5236_s1 + $0x218] sm:$0xff] }
  0xd8   :  { %3186 = vmatprep.subr.mxu0 %v1001_v16  ;;  %3226 = vmatprep.subr.mxu1 %v1035_v17  ;;  %v309_v25 = vpop.f32.mrf.mxu1  ;;  %v386_v6 = vpop.f32.mrf.mxu0  ;;  %v1011_v16 = vld [vmem:[%s5236_s1 + $0x328] sm:$0xff]  ;;  %v992_v18 = vld [vmem:[%s5236_s1 + $0x290] sm:$0xff] }
  0xd9   :  { %1241 = vmatmul.mubr.f32.gmra.mxu0 %v878_v14  ;;  %1321 = vmatmul.mubr.f32.gmra.mxu1 %v864_v19  ;;  %v310_v38 = vadd.f32 %v309_v25, %v4240_v5  ;;  %v896_v52 = vmax.f32 %v308_v40, 0.0  ;;  %v1027_v14 = vld [vmem:[%s5236_s1 + $0x3a8] sm:$0xff]  ;;  %v1026_v19 = vld [vmem:[%s5236_s1 + $0x3a0] sm:$0xff]  ;;  %v379_v25 = vadd.f32 %v4249_v11, %v4199_v29  ;;  %v1024_v11 = vld [vmem:[%s5236_s1 + $0x390] sm:$0xff]  ;;  %v385_v40 = vadd.f32 %v4325_v59, %v4205_v36 }
  0xda   :  { %3187 = vmatpush3.msra.mxu0 %v985_v21  ;;  %3227 = vmatpush3.msra.mxu1 %v1019_v22  ;;  %v4280_v34 = vpop.f32.mrf.mxu1  ;;  %v4374_v17 = vpop.f32.mrf.mxu0  ;;  %v976_v21 = vld [vmem:[%s5236_s1 + $0x210] sm:$0xff]  ;;  %v1010_v22 = vld [vmem:[%s5236_s1 + $0x320] sm:$0xff] }
  0xdb   :  { %1245 = vmatprep.mubr.f32.mxu0 %v895_v26  ;;  %3188 = vmatprep.subr.mxu0 %v1000_v24  ;;  %v897_v48 = vmax.f32 %v310_v38, 0.0  ;;  %v1025_v24 = vld [vmem:[%s5236_s1 + $0x398] sm:$0xff]  ;;  %v975_v26 = vld [vmem:[%s5236_s1 + $0x208] sm:$0xff]  ;;  %v1008_v37 = vld [vmem:[%s5236_s1 + $0x310] sm:$0xff]  ;;  %v391_v59 = vadd.f32 %v4374_v17, %v4211_v45 }
  0xdc   :  { %3228 = vmatprep.subr.mxu1 %v1034_v28  ;;  %3189 = vmatpush3.msra.mxu0 %v984_v30  ;;  %v469_v46 = vpop.f32.mrf.mxu1  ;;  %v387_v28 = vadd.f32 %v386_v6, %v4205_v36  ;;  %v392_v30 = vpop.f32.mrf.mxu0  ;;  %v1023_v38 = vld [vmem:[%s5236_s1 + $0x388] sm:$0xff] }
  0xdd   :  { %3229 = vmatpush3.msra.mxu1 %v1018_v33  ;;  %1325 = vmatprep.mubr.f32.mxu1 %v881_v27  ;;  %v470_v53 = vadd.f32 %v469_v46, %v4199_v29  ;;  %v1009_v27 = vld [vmem:[%s5236_s1 + $0x318] sm:$0xff] }
  0xde   :  { %3190 = vmatprep.subr.mxu0 %v999_v39  ;;  %3230 = vmatprep.subr.mxu1 %v1033_v31  ;;  %v4354_v9 = vpop.f32.mrf.mxu1  ;;  %v850_v39 = vmax.f32 %v379_v25, 0.0  ;;  %v1069_v31 = vld [vmem:[%s5236_s1 + $0x4f8] sm:$0xff]  ;;  %v1098_v25 = vld [vmem:[%s5236_s1 + $0x5e0] sm:$0xff] }
  0xdf   :  { %1246 = vmatmul.mubr.f32.gmra.mxu0 %v894_v41  ;;  %1326 = vmatmul.mubr.f32.gmra.mxu1 %v880_v35  ;;  %v853_v62 = vmax.f32 %v470_v53, 0.0  ;;  %v974_v35 = vld [vmem:[%s5236_s1 + $0x200] sm:$0xff]  ;;  %v867_v41 = vmax.f32 %v387_v28, 0.0  ;;  %v1053_v46 = vld [vmem:[%s5236_s1 + $0x478] sm:$0xff]  ;;  %v866_v53 = vmax.f32 %v385_v40, 0.0 }
  0xe0   :  { %3191 = vmatpush3.msra.mxu0 %v983_v42  ;;  %3231 = vmatpush3.msra.mxu1 %v1017_v43  ;;  %v475_v20 = vpop.f32.mrf.mxu1  ;;  %v468_v42 = vadd.f32 %v4280_v34, %v4199_v29  ;;  %v396_v43 = vpop.f32.mrf.mxu0  ;;  %v1068_v34 = vld [vmem:[%s5236_s1 + $0x4f0] sm:$0xff]  ;;  %v1082_v28 = vld [vmem:[%s5236_s1 + $0x560] sm:$0xff]  ;;  %v1081_v40 = vld [vmem:[%s5236_s1 + $0x558] sm:$0xff] }
  0xe1   :  { %3192 = vmatprep.subr.mxu0 %v998_v44  ;;  %1400 = vmatprep.mubr.f32.mxu0 %v851_v47  ;;  %v1007_v44 = vld [vmem:[%s5236_s1 + $0x308] sm:$0xff] }
  0xe2   :  { %3232 = vmatprep.subr.mxu1 %v1032_v49  ;;  %3193 = vmatpush3.msra.mxu0 %v982_v50  ;;  %v4409_v33 = vpop.f32.mrf.mxu1  ;;  %v393_v49 = vadd.f32 %v392_v30, %v4211_v45  ;;  %v476_v50 = vadd.f32 %v475_v20, %v4205_v36 }
  0xe3   :  { %3233 = vmatpush3.msra.mxu1 %v1016_v51  ;;  %1330 = vmatprep.mubr.f32.mxu1 %v897_v48  ;;  %v1022_v48 = vld [vmem:[%s5236_s1 + $0x380] sm:$0xff] }
  0xe4   :  { %3194 = vmatprep.subr.mxu0 %v997_v54  ;;  %3234 = vmatprep.subr.mxu1 %v1031_v55  ;;  %v481_v47 = vpop.f32.mrf.mxu1  ;;  %v1006_v51 = vld [vmem:[%s5236_s1 + $0x300] sm:$0xff]  ;;  %v852_v54 = vmax.f32 %v468_v42, 0.0  ;;  %v398_v55 = vpop.f32.mrf.mxu0 }
  0xe5   :  { %1331 = vmatmul.mubr.f32.gmra.mxu1 %v896_v52  ;;  %3195 = vmatpush3.msra.mxu0 %v981_v56  ;;  %v1052_v52 = vld [vmem:[%s5236_s1 + $0x470] sm:$0xff]  ;;  %v1067_v56 = vld [vmem:[%s5236_s1 + $0x4e8] sm:$0xff]  ;;  %v1062_v42 = vld [vmem:[%s5236_s1 + $0x4c0] sm:$0xff] }
  0xe6   :  { %3235 = vmatpush3.msra.mxu1 %v1015_v57  ;;  %3196 = vmatprep.subr.mxu0 %v996_v58  ;;  %v1101_v57 = vld [vmem:[%s5236_s1 + $0x5f8] sm:$0xff]  ;;  %v4453_v58 = vpop.f32.mrf.mxu1  ;;  %v4472_v6 = vpop.f32.mrf.mxu0 }
  0xe7   :  { %3236 = vmatprep.subr.mxu1 %v1030_v60  ;;  %3197 = vmatpush3.msra.mxu0 %v980_v61  ;;  %v883_v60 = vmax.f32 %v393_v49, 0.0  ;;  %v474_v61 = vadd.f32 %v4354_v9, %v4205_v36  ;;  %v1084_v9 = vld [vmem:[%s5236_s1 + $0x570] sm:$0xff]  ;;  %v1095_v49 = vld [vmem:[%s5236_s1 + $0x5c8] sm:$0xff] }
  0xe8   :  { %3237 = vmatpush3.msra.mxu1 %v1014_v63  ;;  %3198 = vmatprep.subr.mxu0 %v995_v0  ;;  %v1051_v63 = vld [vmem:[%s5236_s1 + $0x468] sm:$0xff]  ;;  %v1085_v0 = vld [vmem:[%s5236_s1 + $0x578] sm:$0xff]  ;;  %v558_v20 = vpop.f32.mrf.mxu0 }
  0xe9   :  { %3238 = vmatprep.subr.mxu1 %v1029_v1  ;;  %1485 = vmatprep.mubr.f32.mxu1 %v853_v62  ;;  %v869_v62 = vmax.f32 %v476_v50, 0.0  ;;  %v1066_v1 = vld [vmem:[%s5236_s1 + $0x4e0] sm:$0xff]  ;;  %v559_v30 = vadd.f32 %v558_v20, %v4199_v29  ;;  %v1045_v50 = vld [vmem:[%s5236_s1 + $0x438] sm:$0xff]  ;;  %v557_v20 = vadd.f32 %v4472_v6, %v4199_v29  ;;  %v1088_v6 = vld [vmem:[%s5236_s1 + $0x590] sm:$0xff] }
  0xea   :  { %3199 = vmatpush3.msra.mxu0 %v979_v3  ;;  %3239 = vmatpush3.msra.mxu1 %v1013_v4  ;;  %v1100_v3 = vld [vmem:[%s5236_s1 + $0x5f0] sm:$0xff]  ;;  %v399_v4 = vadd.f32 %v398_v55, %v4240_v5  ;;  %v1094_v55 = vld [vmem:[%s5236_s1 + $0x5c0] sm:$0xff] }
  0xeb   :  { %3200 = vmatprep.subr.mxu0 %v994_v7  ;;  %3240 = vmatprep.subr.mxu1 %v1028_v8  ;;  %v482_v7 = vadd.f32 %v481_v47, %v4211_v45  ;;  %v1050_v8 = vld [vmem:[%s5236_s1 + $0x460] sm:$0xff]  ;;  %v1080_v47 = vld [vmem:[%s5236_s1 + $0x550] sm:$0xff] }
  0xec   :  { %3201 = vmatpush3.msra.mxu0 %v978_v10  ;;  %3241 = vmatpush3.msra.mxu1 %v1012_v12  ;;  %v487_v10 = vpop.f32.mrf.mxu1  ;;  %v882_v12 = vmax.f32 %v391_v59, 0.0  ;;  %v899_v17 = vmax.f32 %v399_v4, 0.0  ;;  %v1093_v59 = vld [vmem:[%s5236_s1 + $0x5b8] sm:$0xff]  ;;  %v1076_v4 = vld [vmem:[%s5236_s1 + $0x530] sm:$0xff] }
  0xed   :  { %3202 = vmatprep.subr.mxu0 %v993_v13  ;;  %3242 = vmatprep.subr.mxu1 %v1027_v14  ;;  %v868_v13 = vmax.f32 %v474_v61, 0.0  ;;  %v1065_v14 = vld [vmem:[%s5236_s1 + $0x4d8] sm:$0xff] }
  0xee   :  { %3203 = vmatpush3.msra.mxu0 %v977_v15  ;;  %3243 = vmatpush3.msra.mxu1 %v1011_v16  ;;  %v1099_v15 = vld [vmem:[%s5236_s1 + $0x5e8] sm:$0xff]  ;;  %v397_v16 = vadd.f32 %v396_v43, %v4240_v5  ;;  %v1096_v43 = vld [vmem:[%s5236_s1 + $0x5d0] sm:$0xff]  ;;  %v1077_v61 = vld [vmem:[%s5236_s1 + $0x538] sm:$0xff] }
  0xef   :  { %3204 = vmatprep.subr.mxu0 %v992_v18  ;;  %3244 = vmatprep.subr.mxu1 %v1026_v19  ;;  %v480_v18 = vadd.f32 %v4409_v33, %v4211_v45  ;;  %v885_v19 = vmax.f32 %v482_v7, 0.0  ;;  %v1063_v33 = vld [vmem:[%s5236_s1 + $0x4c8] sm:$0xff]  ;;  %v1057_v7 = vld [vmem:[%s5236_s1 + $0x498] sm:$0xff] }
  0xf0   :  { %3205 = vmatpush3.msra.mxu0 %v976_v21  ;;  %3245 = vmatpush3.msra.mxu1 %v1010_v22  ;;  %v1049_v21 = vld [vmem:[%s5236_s1 + $0x458] sm:$0xff]  ;;  %v1083_v22 = vld [vmem:[%s5236_s1 + $0x568] sm:$0xff] }
  0xf1   :  { %3206 = vmatprep.subr.mxu0 %v991_v23  ;;  %3246 = vmatprep.subr.mxu1 %v1025_v24  ;;  %v4496_v23 = vpop.f32.mrf.mxu1  ;;  %v1064_v24 = vld [vmem:[%s5236_s1 + $0x4d0] sm:$0xff] }
  0xf2   :  { %3207 = vmatpush3.msra.mxu0 %v975_v26  ;;  %3247 = vmatpush3.msra.mxu1 %v1009_v27  ;;  %v488_v26 = vadd.f32 %v487_v10, %v4240_v5  ;;  %v1048_v27 = vld [vmem:[%s5236_s1 + $0x450] sm:$0xff]  ;;  %v1075_v10 = vld [vmem:[%s5236_s1 + $0x528] sm:$0xff] }
  0xf3   :  { %3208 = vmatprep.subr.mxu0 %v990_v32  ;;  %3248 = vmatprep.subr.mxu1 %v1024_v11  ;;  %v898_v32 = vmax.f32 %v397_v16, 0.0  ;;  %v884_v11 = vmax.f32 %v480_v18, 0.0  ;;  %v1040_v16 = vld [vmem:[%s5236_s1 + $0x410] sm:$0xff]  ;;  %v1055_v18 = vld [vmem:[%s5236_s1 + $0x488] sm:$0xff] }
  0xf4   :  { %3209 = vmatpush3.msra.mxu0 %v974_v35  ;;  %3249 = vmatpush3.msra.mxu1 %v1008_v37  ;;  %v1097_v35 = vld [vmem:[%s5236_s1 + $0x5d8] sm:$0xff]  ;;  %v647_v37 = vpop.f32.mrf.mxu1 }
  0xf5   :  { %1401 = vmatmul.mubr.f32.vlgmr.msra.gmra.mxu0 %v850_v39  ;;  %3250 = vmatprep.subr.mxu1 %v1023_v38  ;;  %v1047_v38 = vld [vmem:[%s5236_s1 + $0x448] sm:$0xff]  ;;  %v486_v39 = vadd.f32 %v4453_v58, %v4240_v5 }
  0xf6   :  { %3266 = vmatprep.subr.mxu0 %v1069_v31  ;;  %1405 = vmatprep.mubr.f32.mxu0 %v867_v41  ;;  %v901_v31 = vmax.f32 %v488_v26, 0.0  ;;  %v855_v41 = vmax.f32 %v559_v30, 0.0  ;;  %v1059_v58 = vld [vmem:[%s5236_s1 + $0x4a8] sm:$0xff]  ;;  %v1054_v26 = vld [vmem:[%s5236_s1 + $0x480] sm:$0xff]  ;;  %v1072_v30 = vld [vmem:[%s5236_s1 + $0x510] sm:$0xff] }
  0xf7   :  { %3251 = vmatpush3.msra.mxu1 %v1007_v44  ;;  %3267 = vmatpush3.msra.mxu0 %v1053_v46  ;;  %v648_v44 = vadd.f32 %v647_v37, %v4199_v29  ;;  %v1046_v46 = vld [vmem:[%s5236_s1 + $0x440] sm:$0xff] }
  0xf8   :  { %3252 = vmatprep.subr.mxu1 %v1022_v48  ;;  %3268 = vmatprep.subr.mxu0 %v1068_v34  ;;  %v1061_v48 = vld [vmem:[%s5236_s1 + $0x4b8] sm:$0xff]  ;;  %v900_v34 = vmax.f32 %v486_v39, 0.0 }
  0xf9   :  { %3253 = vmatpush3.msra.mxu1 %v1006_v51  ;;  %3269 = vmatpush3.msra.mxu0 %v1052_v52  ;;  %v1079_v51 = vld [vmem:[%s5236_s1 + $0x548] sm:$0xff]  ;;  %v4551_v52 = vpop.f32.mrf.mxu0 }
  0xfa   :  { %1406 = vmatmul.mubr.f32.gmra.mxu0 %v866_v53  ;;  %1486 = vmatmul.mubr.f32.vlgmr.msra.gmra.mxu1 %v852_v54  ;;  %v857_v53 = vmax.f32 %v648_v44, 0.0  ;;  %v1060_v54 = vld [vmem:[%s5236_s1 + $0x4b0] sm:$0xff] }
  0xfb   :  { %3270 = vmatprep.subr.mxu0 %v1067_v56  ;;  %3310 = vmatprep.subr.mxu1 %v1101_v57  ;;  %v1044_v56 = vld [vmem:[%s5236_s1 + $0x430] sm:$0xff]  ;;  %v1078_v57 = vld [vmem:[%s5236_s1 + $0x540] sm:$0xff] }
  0xfc   :  { %1410 = vmatprep.mubr.f32.mxu0 %v883_v60  ;;  %1490 = vmatprep.mubr.f32.mxu1 %v869_v62  ;;  %v1043_v60 = vld [vmem:[%s5236_s1 + $0x428] sm:$0xff]  ;;  %v564_v62 = vpop.f32.mrf.mxu0 }
  0xfd   :  { %3271 = vmatpush3.msra.mxu0 %v1051_v63  ;;  %3311 = vmatpush3.msra.mxu1 %v1085_v0  ;;  %v1058_v63 = vld [vmem:[%s5236_s1 + $0x4a0] sm:$0xff]  ;;  %v1092_v0 = vld [vmem:[%s5236_s1 + $0x5b0] sm:$0xff] }
  0xfe   :  { %3272 = vmatprep.subr.mxu0 %v1066_v1  ;;  %3312 = vmatprep.subr.mxu1 %v1100_v3  ;;  %v4583_v1 = vpop.f32.mrf.mxu1  ;;  %v1042_v3 = vld [vmem:[%s5236_s1 + $0x420] sm:$0xff] }
  0xff   :  { %3273 = vmatpush3.msra.mxu0 %v1050_v8  ;;  %3313 = vmatpush3.msra.mxu1 %v1084_v9  ;;  %v1091_v8 = vld [vmem:[%s5236_s1 + $0x5a8] sm:$0xff]  ;;  %v1041_v9 = vld [vmem:[%s5236_s1 + $0x418] sm:$0xff] }
 0x100   :  { %1411 = vmatmul.mubr.f32.gmra.mxu0 %v882_v12  ;;  %1491 = vmatmul.mubr.f32.gmra.mxu1 %v868_v13  ;;  %v4603_v12 = vpop.f32.mrf.mxu0  ;;  %v1056_v13 = vld [vmem:[%s5236_s1 + $0x490] sm:$0xff] }
 0x101   :  { %3274 = vmatprep.subr.mxu0 %v1065_v14  ;;  %3314 = vmatprep.subr.mxu1 %v1099_v15  ;;  %v1090_v14 = vld [vmem:[%s5236_s1 + $0x5a0] sm:$0xff]  ;;  %v653_v15 = vpop.f32.mrf.mxu1 }
 0x102   :  { %1415 = vmatprep.mubr.f32.mxu0 %v899_v17  ;;  %1495 = vmatprep.mubr.f32.mxu1 %v885_v19  ;;  %v1074_v17 = vld [vmem:[%s5236_s1 + $0x520] sm:$0xff]  ;;  %v1089_v19 = vld [vmem:[%s5236_s1 + $0x598] sm:$0xff]  ;;  %v654_v44 = vadd.f32 %v653_v15, %v4205_v36 }
 0x103   :  { %3275 = vmatpush3.msra.mxu0 %v1049_v21  ;;  %3315 = vmatpush3.msra.mxu1 %v1083_v22  ;;  %v1039_v21 = vld [vmem:[%s5236_s1 + $0x408] sm:$0xff]  ;;  %v1073_v22 = vld [vmem:[%s5236_s1 + $0x518] sm:$0xff] }
 0x104   :  { %3276 = vmatprep.subr.mxu0 %v1064_v24  ;;  %3316 = vmatprep.subr.mxu1 %v1098_v25  ;;  %v565_v24 = vadd.f32 %v564_v62, %v4205_v36  ;;  %v570_v25 = vpop.f32.mrf.mxu0 }
 0x105   :  { %3277 = vmatpush3.msra.mxu0 %v1048_v27  ;;  %3317 = vmatpush3.msra.mxu1 %v1082_v28  ;;  %v4638_v27 = vpop.f32.mrf.mxu1  ;;  %v1038_v28 = vld [vmem:[%s5236_s1 + $0x400] sm:$0xff] }
 0x106   :  { %1416 = vmatmul.mubr.f32.gmra.mxu0 %v898_v32  ;;  %1496 = vmatmul.mubr.f32.gmra.mxu1 %v884_v11  ;;  %v1087_v32 = vld [vmem:[%s5236_s1 + $0x588] sm:$0xff]  ;;  %v854_v11 = vmax.f32 %v557_v20, 0.0  ;;  %v871_v37 = vmax.f32 %v565_v24, 0.0  ;;  %v574_v39 = vpop.f32.mrf.mxu0  ;;  %v1162_v20 = vld [vmem:[%s5236_s1 + $0x7e0] sm:$0xff] }
 0x107   :  { %3278 = vmatprep.subr.mxu0 %v1063_v33  ;;  %3318 = vmatprep.subr.mxu1 %v1097_v35  ;;  %v1133_v33 = vld [vmem:[%s5236_s1 + $0x6f8] sm:$0xff]  ;;  %v563_v35 = vadd.f32 %v4551_v52, %v4205_v36  ;;  %v1146_v24 = vld [vmem:[%s5236_s1 + $0x760] sm:$0xff] }
 0x108   :  { %1500 = vmatprep.mubr.f32.mxu1 %v901_v31  ;;  %3279 = vmatpush3.msra.mxu0 %v1047_v38  ;;  %v646_v38 = vadd.f32 %v4496_v23, %v4199_v29  ;;  %v1071_v31 = vld [vmem:[%s5236_s1 + $0x508] sm:$0xff]  ;;  %v1132_v23 = vld [vmem:[%s5236_s1 + $0x6f0] sm:$0xff] }
 0x109   :  { %1570 = vmatprep.mubr.f32.mxu0 %v855_v41  ;;  %3319 = vmatpush3.msra.mxu1 %v1081_v40  ;;  %v1117_v40 = vld [vmem:[%s5236_s1 + $0x678] sm:$0xff]  ;;  %v659_v41 = vpop.f32.mrf.mxu1 }
 0x10a   :  { %3280 = vmatprep.subr.mxu0 %v1062_v42  ;;  %3320 = vmatprep.subr.mxu1 %v1096_v43  ;;  %v1086_v42 = vld [vmem:[%s5236_s1 + $0x580] sm:$0xff]  ;;  %v571_v43 = vadd.f32 %v570_v25, %v4211_v45 }
 0x10b   :  { %3281 = vmatpush3.msra.mxu0 %v1046_v46  ;;  %3321 = vmatpush3.msra.mxu1 %v1080_v47  ;;  %v1070_v46 = vld [vmem:[%s5236_s1 + $0x500] sm:$0xff]  ;;  %v1116_v47 = vld [vmem:[%s5236_s1 + $0x670] sm:$0xff]  ;;  %v4682_v52 = vpop.f32.mrf.mxu1 }
 0x10c   :  { %1501 = vmatmul.mubr.f32.gmra.mxu1 %v900_v34  ;;  %3282 = vmatprep.subr.mxu0 %v1061_v48  ;;  %v870_v48 = vmax.f32 %v563_v35, 0.0  ;;  %v856_v34 = vmax.f32 %v646_v38, 0.0  ;;  %v1145_v35 = vld [vmem:[%s5236_s1 + $0x758] sm:$0xff]  ;;  %v1126_v38 = vld [vmem:[%s5236_s1 + $0x6c0] sm:$0xff] }
 0x10d   :  { %3322 = vmatprep.subr.mxu1 %v1095_v49  ;;  %3283 = vmatpush3.msra.mxu0 %v1045_v50  ;;  %v576_v49 = vpop.f32.mrf.mxu0  ;;  %v1131_v50 = vld [vmem:[%s5236_s1 + $0x6e8] sm:$0xff] }
 0x10e   :  { %3323 = vmatpush3.msra.mxu1 %v1079_v51  ;;  %1655 = vmatprep.mubr.f32.mxu1 %v857_v53  ;;  %v1165_v51 = vld [vmem:[%s5236_s1 + $0x7f8] sm:$0xff]  ;;  %v569_v53 = vadd.f32 %v4603_v12, %v4211_v45 }
 0x10f   :  { %3284 = vmatprep.subr.mxu0 %v1060_v54  ;;  %3324 = vmatprep.subr.mxu1 %v1094_v55  ;;  %v887_v54 = vmax.f32 %v571_v43, 0.0  ;;  %v652_v55 = vadd.f32 %v4583_v1, %v4205_v36  ;;  %v4701_v62 = vpop.f32.mrf.mxu0  ;;  %v1148_v1 = vld [vmem:[%s5236_s1 + $0x770] sm:$0xff] }
 0x110   :  { %3285 = vmatpush3.msra.mxu0 %v1044_v56  ;;  %3325 = vmatpush3.msra.mxu1 %v1078_v57  ;;  %v873_v56 = vmax.f32 %v654_v44, 0.0  ;;  %v1115_v57 = vld [vmem:[%s5236_s1 + $0x668] sm:$0xff] }
 0x111   :  { %3286 = vmatprep.subr.mxu0 %v1059_v58  ;;  %3326 = vmatprep.subr.mxu1 %v1093_v59  ;;  %v1149_v58 = vld [vmem:[%s5236_s1 + $0x778] sm:$0xff]  ;;  %v1130_v59 = vld [vmem:[%s5236_s1 + $0x6e0] sm:$0xff]  ;;  %v736_v15 = vpop.f32.mrf.mxu0  ;;  %v1159_v44 = vld [vmem:[%s5236_s1 + $0x7c8] sm:$0xff] }
 0x112   :  { %3287 = vmatpush3.msra.mxu0 %v1043_v60  ;;  %3327 = vmatpush3.msra.mxu1 %v1077_v61  ;;  %v1164_v60 = vld [vmem:[%s5236_s1 + $0x7f0] sm:$0xff]  ;;  %v577_v61 = vadd.f32 %v576_v49, %v4240_v5  ;;  %v737_v25 = vadd.f32 %v736_v15, %v4199_v29  ;;  %v1158_v49 = vld [vmem:[%s5236_s1 + $0x7c0] sm:$0xff]  ;;  %v1119_v15 = vld [vmem:[%s5236_s1 + $0x688] sm:$0xff] }
 0x113   :  { %3288 = vmatprep.subr.mxu0 %v1058_v63  ;;  %3328 = vmatprep.subr.mxu1 %v1092_v0  ;;  %v660_v63 = vadd.f32 %v659_v41, %v4211_v45  ;;  %v1114_v0 = vld [vmem:[%s5236_s1 + $0x660] sm:$0xff]  ;;  %v1144_v41 = vld [vmem:[%s5236_s1 + $0x750] sm:$0xff] }
 0x114   :  { %3289 = vmatpush3.msra.mxu0 %v1042_v3  ;;  %3329 = vmatpush3.msra.mxu1 %v1076_v4  ;;  %v665_v3 = vpop.f32.mrf.mxu1  ;;  %v886_v4 = vmax.f32 %v569_v53, 0.0  ;;  %v903_v12 = vmax.f32 %v577_v61, 0.0  ;;  %v1142_v53 = vld [vmem:[%s5236_s1 + $0x740] sm:$0xff] }
 0x115   :  { %3290 = vmatprep.subr.mxu0 %v1057_v7  ;;  %3330 = vmatprep.subr.mxu1 %v1091_v8  ;;  %v872_v7 = vmax.f32 %v652_v55, 0.0  ;;  %v1129_v8 = vld [vmem:[%s5236_s1 + $0x6d8] sm:$0xff] }
 0x116   :  { %3291 = vmatpush3.msra.mxu0 %v1041_v9  ;;  %3331 = vmatpush3.msra.mxu1 %v1075_v10  ;;  %v1163_v9 = vld [vmem:[%s5236_s1 + $0x7e8] sm:$0xff]  ;;  %v575_v10 = vadd.f32 %v574_v39, %v4240_v5  ;;  %v1160_v39 = vld [vmem:[%s5236_s1 + $0x7d0] sm:$0xff]  ;;  %v1157_v55 = vld [vmem:[%s5236_s1 + $0x7b8] sm:$0xff] }
 0x117   :  { %3292 = vmatprep.subr.mxu0 %v1056_v13  ;;  %3332 = vmatprep.subr.mxu1 %v1090_v14  ;;  %v658_v13 = vadd.f32 %v4638_v27, %v4211_v45  ;;  %v889_v14 = vmax.f32 %v660_v63, 0.0  ;;  %v1127_v27 = vld [vmem:[%s5236_s1 + $0x6c8] sm:$0xff]  ;;  %v1106_v63 = vld [vmem:[%s5236_s1 + $0x620] sm:$0xff] }
 0x118   :  { %3293 = vmatpush3.msra.mxu0 %v1040_v16  ;;  %3333 = vmatpush3.msra.mxu1 %v1074_v17  ;;  %v1113_v16 = vld [vmem:[%s5236_s1 + $0x658] sm:$0xff]  ;;  %v1147_v17 = vld [vmem:[%s5236_s1 + $0x768] sm:$0xff] }
 0x119   :  { %3294 = vmatprep.subr.mxu0 %v1055_v18  ;;  %3334 = vmatprep.subr.mxu1 %v1089_v19  ;;  %v4725_v18 = vpop.f32.mrf.mxu1  ;;  %v1128_v19 = vld [vmem:[%s5236_s1 + $0x6d0] sm:$0xff] }
 0x11a   :  { %3295 = vmatpush3.msra.mxu0 %v1039_v21  ;;  %3335 = vmatpush3.msra.mxu1 %v1073_v22  ;;  %v666_v21 = vadd.f32 %v665_v3, %v4240_v5  ;;  %v1112_v22 = vld [vmem:[%s5236_s1 + $0x650] sm:$0xff]  ;;  %v1155_v3 = vld [vmem:[%s5236_s1 + $0x7a8] sm:$0xff] }
 0x11b   :  { %3296 = vmatprep.subr.mxu0 %v1054_v26  ;;  %3336 = vmatprep.subr.mxu1 %v1088_v6  ;;  %v902_v26 = vmax.f32 %v575_v10, 0.0  ;;  %v888_v6 = vmax.f32 %v658_v13, 0.0  ;;  %v1104_v13 = vld [vmem:[%s5236_s1 + $0x610] sm:$0xff] }
 0x11c   :  { %3297 = vmatpush3.msra.mxu0 %v1038_v28  ;;  %3337 = vmatpush3.msra.mxu1 %v1072_v30  ;;  %v1161_v28 = vld [vmem:[%s5236_s1 + $0x7d8] sm:$0xff]  ;;  %v825_v30 = vpop.f32.mrf.mxu1 }
 0x11d   :  { %1571 = vmatmul.mubr.f32.vlgmr.msra.gmra.mxu0 %v854_v11  ;;  %3338 = vmatprep.subr.mxu1 %v1087_v32  ;;  %v1111_v32 = vld [vmem:[%s5236_s1 + $0x648] sm:$0xff]  ;;  %v664_v11 = vadd.f32 %v4682_v52, %v4240_v5  ;;  %v1108_v52 = vld [vmem:[%s5236_s1 + $0x630] sm:$0xff] }
 0x11e   :  { %3354 = vmatprep.subr.mxu0 %v1133_v33  ;;  %1575 = vmatprep.mubr.f32.mxu0 %v871_v37  ;;  %v905_v33 = vmax.f32 %v666_v21, 0.0  ;;  %v859_v37 = vmax.f32 %v737_v25, 0.0 }
 0x11f   :  { %3339 = vmatpush3.msra.mxu1 %v1071_v31  ;;  %3355 = vmatpush3.msra.mxu0 %v1117_v40  ;;  %v826_v31 = vadd.f32 %v825_v30, %v4199_v29  ;;  %v1110_v40 = vld [vmem:[%s5236_s1 + $0x640] sm:$0xff]  ;;  %v904_v43 = vmax.f32 %v664_v11, 0.0  ;;  %v1135_v11 = vld [vmem:[%s5236_s1 + $0x708] sm:$0xff] }
 0x120   :  { %3340 = vmatprep.subr.mxu1 %v1086_v42  ;;  %3356 = vmatprep.subr.mxu0 %v1132_v23  ;;  %v4768_v42 = vpop.f32.mrf.mxu0  ;;  %v1125_v23 = vld [vmem:[%s5236_s1 + $0x6b8] sm:$0xff] }
 0x121   :  { %3341 = vmatpush3.msra.mxu1 %v1070_v46  ;;  %3357 = vmatpush3.msra.mxu0 %v1116_v47  ;;  %v1109_v46 = vld [vmem:[%s5236_s1 + $0x638] sm:$0xff]  ;;  %v1143_v47 = vld [vmem:[%s5236_s1 + $0x748] sm:$0xff]  ;;  %v741_v30 = vadd.f32 %v4768_v42, %v4205_v36 }
 0x122   :  { %1576 = vmatmul.mubr.f32.gmra.mxu0 %v870_v48  ;;  %1656 = vmatmul.mubr.f32.vlgmr.msra.gmra.mxu1 %v856_v34  ;;  %v861_v48 = vmax.f32 %v826_v31, 0.0  ;;  %v1124_v34 = vld [vmem:[%s5236_s1 + $0x6b0] sm:$0xff] }
 0x123   :  { %3358 = vmatprep.subr.mxu0 %v1131_v50  ;;  %3398 = vmatprep.subr.mxu1 %v1165_v51  ;;  %v742_v50 = vpop.f32.mrf.mxu0  ;;  %v4788_v51 = vpop.f32.mrf.mxu1 }
 0x124   :  { %1580 = vmatprep.mubr.f32.mxu0 %v887_v54  ;;  %1660 = vmatprep.mubr.f32.mxu1 %v873_v56  ;;  %v1123_v54 = vld [vmem:[%s5236_s1 + $0x6a8] sm:$0xff]  ;;  %v743_v21 = vadd.f32 %v742_v50, %v4205_v36  ;;  %v830_v42 = vadd.f32 %v4788_v51, %v4205_v36 }
 0x125   :  { %3359 = vmatpush3.msra.mxu0 %v1115_v57  ;;  %3399 = vmatpush3.msra.mxu1 %v1149_v58  ;;  %v1107_v56 = vld [vmem:[%s5236_s1 + $0x628] sm:$0xff]  ;;  %v1141_v57 = vld [vmem:[%s5236_s1 + $0x738] sm:$0xff]  ;;  %v1122_v58 = vld [vmem:[%s5236_s1 + $0x6a0] sm:$0xff]  ;;  %v831_v61 = vpop.f32.mrf.mxu1 }
 0x126   :  { %3360 = vmatprep.subr.mxu0 %v1130_v59  ;;  %3400 = vmatprep.subr.mxu1 %v1164_v60  ;;  %v1156_v59 = vld [vmem:[%s5236_s1 + $0x7b0] sm:$0xff]  ;;  %v4814_v60 = vpop.f32.mrf.mxu0 }
 0x127   :  { %3361 = vmatpush3.msra.mxu0 %v1114_v0  ;;  %3401 = vmatpush3.msra.mxu1 %v1148_v1  ;;  %v1140_v0 = vld [vmem:[%s5236_s1 + $0x730] sm:$0xff]  ;;  %v1121_v1 = vld [vmem:[%s5236_s1 + $0x698] sm:$0xff] }
 0x128   :  { %1581 = vmatmul.mubr.f32.gmra.mxu0 %v886_v4  ;;  %1661 = vmatmul.mubr.f32.gmra.mxu1 %v872_v7  ;;  %v1105_v4 = vld [vmem:[%s5236_s1 + $0x618] sm:$0xff]  ;;  %v1139_v7 = vld [vmem:[%s5236_s1 + $0x728] sm:$0xff]  ;;  %v748_v10 = vpop.f32.mrf.mxu0 }
 0x129   :  { %3362 = vmatprep.subr.mxu0 %v1129_v8  ;;  %3402 = vmatprep.subr.mxu1 %v1163_v9  ;;  %v1120_v8 = vld [vmem:[%s5236_s1 + $0x690] sm:$0xff]  ;;  %v1154_v9 = vld [vmem:[%s5236_s1 + $0x7a0] sm:$0xff] }
 0x12a   :  { %1585 = vmatprep.mubr.f32.mxu0 %v903_v12  ;;  %1665 = vmatprep.mubr.f32.mxu1 %v889_v14  ;;  %v4840_v12 = vpop.f32.mrf.mxu1  ;;  %v1138_v14 = vld [vmem:[%s5236_s1 + $0x720] sm:$0xff] }
 0x12b   :  { %3363 = vmatpush3.msra.mxu0 %v1113_v16  ;;  %3403 = vmatpush3.msra.mxu1 %v1147_v17  ;;  %v1153_v16 = vld [vmem:[%s5236_s1 + $0x798] sm:$0xff]  ;;  %v735_v17 = vadd.f32 %v4701_v62, %v4199_v29  ;;  %v1152_v62 = vld [vmem:[%s5236_s1 + $0x790] sm:$0xff] }
 0x12c   :  { %3364 = vmatprep.subr.mxu0 %v1128_v19  ;;  %3404 = vmatprep.subr.mxu1 %v1162_v20  ;;  %v1103_v19 = vld [vmem:[%s5236_s1 + $0x608] sm:$0xff]  ;;  %v1137_v20 = vld [vmem:[%s5236_s1 + $0x718] sm:$0xff]  ;;  %v837_v25 = vpop.f32.mrf.mxu1 }
 0x12d   :  { %3365 = vmatpush3.msra.mxu0 %v1112_v22  ;;  %3405 = vmatpush3.msra.mxu1 %v1146_v24  ;;  %v1118_v22 = vld [vmem:[%s5236_s1 + $0x680] sm:$0xff]  ;;  %v752_v24 = vpop.f32.mrf.mxu0 }
 0x12e   :  { %1586 = vmatmul.mubr.f32.gmra.mxu0 %v902_v26  ;;  %1666 = vmatmul.mubr.f32.gmra.mxu1 %v888_v6  ;;  %v1102_v26 = vld [vmem:[%s5236_s1 + $0x600] sm:$0xff]  ;;  %v1136_v6 = vld [vmem:[%s5236_s1 + $0x710] sm:$0xff]  ;;  %v841_v31 = vpop.f32.mrf.mxu1 }
 0x12f   :  { %3366 = vmatprep.subr.mxu0 %v1127_v27  ;;  %3406 = vmatprep.subr.mxu1 %v1161_v28  ;;  %v1151_v27 = vld [vmem:[%s5236_s1 + $0x788] sm:$0xff]  ;;  %v858_v28 = vmax.f32 %v735_v17, 0.0 }
 0x130   :  { %1670 = vmatprep.mubr.f32.mxu1 %v905_v33  ;;  %3367 = vmatpush3.msra.mxu0 %v1111_v32  ;;  %v824_v32 = vadd.f32 %v4725_v18, %v4199_v29  ;;  %v875_v33 = vmax.f32 %v743_v21, 0.0  ;;  %v1134_v29 = vld [vmem:[%s5236_s1 + $0x700] sm:$0xff]  ;;  %v874_v18 = vmax.f32 %v741_v30, 0.0 }
 0x131   :  { %1740 = vmatprep.mubr.f32.mxu0 %v859_v37  ;;  %3407 = vmatpush3.msra.mxu1 %v1145_v35  ;;  %v749_v35 = vadd.f32 %v748_v10, %v4211_v45  ;;  %v832_v37 = vadd.f32 %v831_v61, %v4205_v36  ;;  %v836_v36 = vadd.f32 %v4840_v12, %v4211_v45  ;;  %v4931_v61 = vld [vmem:[%s5239_s4 + $0x28] sm:$0xff] }
 0x132   :  { %3368 = vmatprep.subr.mxu0 %v1126_v38  ;;  %3408 = vmatprep.subr.mxu1 %v1160_v39  ;;  %v1150_v38 = vld [vmem:[%s5236_s1 + $0x780] sm:$0xff]  ;;  %v754_v39 = vpop.f32.mrf.mxu0  ;;  %5258 = vst [vmem:[#allocation7_spill] sm:$0xff] %v4931_v61 }
 0x133   :  { %3369 = vmatpush3.msra.mxu0 %v1110_v40  ;;  %3409 = vmatpush3.msra.mxu1 %v1144_v41  ;;  %v747_v40 = vadd.f32 %v4814_v60, %v4211_v45  ;;  %v860_v41 = vmax.f32 %v824_v32, 0.0  ;;  %v1879_v60 = vld [vmem:[%s5239_s4 + $0x8] sm:$0xff] }
 0x134   :  { %1671 = vmatmul.mubr.f32.gmra.mxu1 %v904_v43  ;;  %3370 = vmatprep.subr.mxu0 %v1125_v23  ;;  %v891_v23 = vmax.f32 %v749_v35, 0.0  ;;  %v755_v43 = vadd.f32 %v754_v39, %v4240_v5 }
 0x135   :  { %3410 = vmatprep.subr.mxu1 %v1159_v44  ;;  %3371 = vmatpush3.msra.mxu0 %v1109_v46  ;;  %v877_v44 = vmax.f32 %v832_v37, 0.0  ;;  %v838_v46 = vadd.f32 %v837_v25, %v4211_v45  ;;  %v1881_v45 = vld [vmem:[%s5239_s4 + $0x18] sm:$0xff] }
 0x136   :  { %3411 = vmatpush3.msra.mxu1 %v1143_v47  ;;  %1825 = vmatprep.mubr.f32.mxu1 %v861_v48  ;;  %v843_v47 = vpop.f32.mrf.mxu1  ;;  %v890_v48 = vmax.f32 %v747_v40, 0.0  ;;  %v907_v50 = vmax.f32 %v755_v43, 0.0 }
 0x137   :  { %3372 = vmatprep.subr.mxu0 %v1124_v34  ;;  %3412 = vmatprep.subr.mxu1 %v1158_v49  ;;  %v753_v34 = vadd.f32 %v752_v24, %v4240_v5  ;;  %v876_v49 = vmax.f32 %v830_v42, 0.0  ;;  %v893_v51 = vmax.f32 %v838_v46, 0.0 }
 0x138   :  { %3373 = vmatpush3.msra.mxu0 %v1108_v52  ;;  %3413 = vmatpush3.msra.mxu1 %v1142_v53  ;;  %v844_v52 = vadd.f32 %v843_v47, %v4240_v5 }
 0x139   :  { %3374 = vmatprep.subr.mxu0 %v1123_v54  ;;  %3414 = vmatprep.subr.mxu1 %v1157_v55  ;;  %v906_v53 = vmax.f32 %v753_v34, 0.0  ;;  %v892_v54 = vmax.f32 %v836_v36, 0.0  ;;  %v842_v55 = vadd.f32 %v841_v31, %v4240_v5  ;;  %v4921_v5 = vld [vmem:[%s5239_s4 + $0x30] sm:$0xff] }
 0x13a   :  { %3375 = vmatpush3.msra.mxu0 %v1107_v56  ;;  %3415 = vmatpush3.msra.mxu1 %v1141_v57  ;;  %v909_v56 = vmax.f32 %v844_v52, 0.0  ;;  %5257 = vst [vmem:[#allocation6_spill] sm:$0xff] %v4921_v5 }
 0x13b   :  { %3376 = vmatprep.subr.mxu0 %v1122_v58  ;;  %3416 = vmatprep.subr.mxu1 %v1156_v59  ;;  %v908_v57 = vmax.f32 %v842_v55, 0.0  ;;  %v4912_v58 = vld [vmem:[%s5239_s4 + $0x38] sm:$0xff]  ;;  %v1880_v59 = vld [vmem:[%s5239_s4 + $0x10] sm:$0xff] }
 0x13c   :  { %3377 = vmatpush3.msra.mxu0 %v1106_v63  ;;  %3417 = vmatpush3.msra.mxu1 %v1140_v0  ;;  %5256 = vst [vmem:[#allocation5_spill] sm:$0xff] %v4912_v58  ;;  %v1878_v63 = vld [vmem:[%s5239_s4] sm:$0xff] }
 0x13d   :  { %3378 = vmatprep.subr.mxu0 %v1121_v1  ;;  %3418 = vmatprep.subr.mxu1 %v1155_v3  ;;  %v4943_v0 = vld [vmem:[%s5239_s4 + $0x20] sm:$0xff] }
 0x13e   :  { %3379 = vmatpush3.msra.mxu0 %v1105_v4  ;;  %3419 = vmatpush3.msra.mxu1 %v1139_v7  ;;  %5259 = vst [vmem:[#allocation8_spill] sm:$0xff] %v4943_v0 }
 0x13f   :  { %3380 = vmatprep.subr.mxu0 %v1120_v8  ;;  %3420 = vmatprep.subr.mxu1 %v1154_v9 }
 0x140   :  { %3381 = vmatpush3.msra.mxu0 %v1104_v13  ;;  %3421 = vmatpush3.msra.mxu1 %v1138_v14 }
 0x141   :  { %3382 = vmatprep.subr.mxu0 %v1119_v15  ;;  %3422 = vmatprep.subr.mxu1 %v1153_v16 }
 0x142   :  { %3383 = vmatpush3.msra.mxu0 %v1103_v19  ;;  %3423 = vmatpush3.msra.mxu1 %v1137_v20 }
 0x143   :  { %3384 = vmatprep.subr.mxu0 %v1118_v22  ;;  %3424 = vmatprep.subr.mxu1 %v1152_v62 }
 0x144   :  { %3385 = vmatpush3.msra.mxu0 %v1102_v26  ;;  %3425 = vmatpush3.msra.mxu1 %v1136_v6 }
 0x145   :  { %1741 = vmatmul.mubr.f32.vlgmr.msra.gmra.mxu0 %v858_v28  ;;  %3426 = vmatprep.subr.mxu1 %v1151_v27 }
 0x146   :  { %1745 = vmatprep.mubr.f32.mxu0 %v875_v33  ;;  %3427 = vmatpush3.msra.mxu1 %v1135_v11 }
 0x147   :  { %3428 = vmatprep.subr.mxu1 %v1150_v38  ;;  %3513 = vmatprep.subr.mxu0 %v5246_v2 }
 0x148   :  { %3429 = vmatpush3.msra.mxu1 %v1134_v29  ;;  %3514 = vmatpush3.msra.mxu0 %v1881_v45 }
 0x149   :  { %1746 = vmatmul.mubr.f32.gmra.mxu0 %v874_v18  ;;  %1826 = vmatmul.mubr.f32.vlgmr.msra.gmra.mxu1 %v860_v41 }
 0x14a   :  { %1750 = vmatprep.mubr.f32.mxu0 %v891_v23  ;;  %1830 = vmatprep.mubr.f32.mxu1 %v877_v44 }
 0x14b   :  { %3524 = vmatprep.subr.mxu1 %v5246_v2  ;;  %3515 = vmatprep.subr.mxu0 %v5246_v2 }
 0x14c   :  { %3525 = vmatpush3.msra.mxu1 %v4912_v58  ;;  %3516 = vmatpush3.msra.mxu0 %v1880_v59 }
 0x14d   :  { %1751 = vmatmul.mubr.f32.gmra.mxu0 %v890_v48  ;;  %1831 = vmatmul.mubr.f32.gmra.mxu1 %v876_v49 }
 0x14e   :  { %1755 = vmatprep.mubr.f32.mxu0 %v907_v50  ;;  %1835 = vmatprep.mubr.f32.mxu1 %v893_v51 }
 0x14f   :  { %3526 = vmatprep.subr.mxu1 %v5246_v2  ;;  %3517 = vmatprep.subr.mxu0 %v5246_v2 }
 0x150   :  { %3527 = vmatpush3.msra.mxu1 %v4921_v5  ;;  %3518 = vmatpush3.msra.mxu0 %v1879_v60 }
 0x151   :  { %1756 = vmatmul.mubr.f32.gmra.mxu0 %v906_v53  ;;  %1836 = vmatmul.mubr.f32.gmra.mxu1 %v892_v54 }
 0x152   :  { %1840 = vmatprep.mubr.f32.mxu1 %v909_v56  ;;  %3528 = vmatprep.subr.mxu1 %v5246_v2 }
 0x153   :  { %3529 = vmatpush3.msra.mxu1 %v4931_v61  ;;  %3519 = vmatprep.subr.mxu0 %v5246_v2 }
 0x154   :  { %3530 = vmatprep.subr.mxu1 %v5246_v2  ;;  %3520 = vmatpush3.msra.mxu0 %v1878_v63 }
 0x155   :  { %1841 = vmatmul.mubr.f32.gmra.mxu1 %v908_v57  ;;  %3521 = vmatprep.mubr.msk.f32.mxu0 %vm3772_vm2, %v5246_v2 }
 0x156   :  { %3531 = vmatpush3.msra.mxu1 %v4943_v0  ;;  %3532 = vmatprep.mubr.msk.f32.mxu1 %vm3772_vm2, %v5246_v2 }
 0x157   :  { %3535 = vmatprep.subr.mxu0 %v5246_v2  ;;  %3554 = vmatprep.subr.mxu1 %v5246_v2 }
 0x159   :  { %3533 = vmatmul.mubr.f32.vlgmr.msra.gmra.mxu1 %v5246_v2 }
 0x15a   :  { %3562 = vmatprep.mubr.msk.f32.mxu1 %vm3772_vm2, %v5246_v2  ;;  %3555 = vmatpush3.msra.mxu1 %v4912_v58 }
 0x15b   :  { %3556 = vmatprep.subr.mxu1 %v5246_v2 }
 0x15c   :  { %3557 = vmatpush3.msra.mxu1 %v4921_v5 }
 0x15d   :  { %3558 = vmatprep.subr.mxu1 %v5246_v2 }
 0x15e   :  { %3559 = vmatpush3.msra.mxu1 %v4931_v61 }
 0x15f   :  { %3560 = vmatprep.subr.mxu1 %v5246_v2 }
 0x160   :  { %3561 = vmatpush3.msra.mxu1 %v4943_v0 }
 0x161   :  { %3565 = vmatprep.subr.mxu1 %v5246_v2 }
 0x18e   :  { %v3122_v1 = vpop.f32.mrf.mxu0 }
 0x190   :  { %v3123_v3 = vpop.f32.mrf.mxu0 }
 0x191   :  { %v3124_v36 = vadd.f32 %v3123_v3, %v3122_v1 }
 0x193   :  { %v3166_v4 = vpop.f32.mrf.mxu1  ;;  %v3125_v7 = vpop.f32.mrf.mxu0 }
 0x195   :  { %v3167_v8 = vpop.f32.mrf.mxu1  ;;  %v3126_v9 = vpop.f32.mrf.mxu0 }
 0x196   :  { %v3168_v48 = vadd.f32 %v3167_v8, %v3166_v4  ;;  %v3127_v56 = vadd.f32 %v3126_v9, %v3125_v7 }
 0x198   :  { %v1318_v51 = vadd.f32 %v3168_v48, %v3124_v36 }
 0x199   :  { %v3169_v10 = vpop.f32.mrf.mxu1  ;;  %v3128_v12 = vpop.f32.mrf.mxu0 }
 0x19b   :  { %v3170_v13 = vpop.f32.mrf.mxu1  ;;  %v3129_v14 = vpop.f32.mrf.mxu0 }
 0x19c   :  { %v3171_v52 = vadd.f32 %v3170_v13, %v3169_v10  ;;  %v3130_v60 = vadd.f32 %v3129_v14, %v3128_v12 }
 0x19e   :  { %v1323_v0 = vadd.f32 %v3171_v52, %v3127_v56 }
 0x19f   :  { %v3172_v15 = vpop.f32.mrf.mxu1  ;;  %v4965_v16 = vpop.f32.mrf.mxu0 }
 0x1a1   :  { %v3173_v17 = vpop.f32.mrf.mxu1  ;;  %v4967_v19 = vpop.f32.mrf.mxu0 }
 0x1a2   :  { %v3174_v63 = vadd.f32 %v3173_v17, %v3172_v15  ;;  %v3133_v15 = vadd.f32 %v4967_v19, %v4965_v16 }
 0x1a5   :  { %v3175_v20 = vpop.f32.mrf.mxu1 }
 0x1a7   :  { %v3176_v22 = vpop.f32.mrf.mxu1 }
 0x1b5   :  { %v3210_v21 = vpop.f32.mrf.mxu0 }
 0x1b7   :  { %v3211_v62 = vpop.f32.mrf.mxu0 }
 0x1b8   :  { %v3212_v50 = vadd.f32 %v3211_v62, %v3210_v21  ;;  %v1328_v62 = vadd.f32 %v3174_v63, %v3130_v60 }
 0x1ba   :  { %v3254_v24 = vpop.f32.mrf.mxu1  ;;  %v3213_v25 = vpop.f32.mrf.mxu0  ;;  %v1403_v57 = vadd.f32 %v3212_v50, %v1318_v51 }
 0x1bc   :  { %v3255_v26 = vpop.f32.mrf.mxu1  ;;  %v3214_v6 = vpop.f32.mrf.mxu0 }
 0x1bd   :  { %v3256_v53 = vadd.f32 %v3255_v26, %v3254_v24  ;;  %v3215_v45 = vadd.f32 %v3214_v6, %v3213_v25  ;;  %v3177_v24 = vadd.f32 %v3176_v22, %v3175_v20 }
 0x1bf   :  { %v1488_v61 = vadd.f32 %v3256_v53, %v1403_v57  ;;  %v1408_v3 = vadd.f32 %v3215_v45, %v1323_v0 }
 0x1c0   :  { %v3257_v27 = vpop.f32.mrf.mxu1  ;;  %v3216_v28 = vpop.f32.mrf.mxu0 }
 0x1c2   :  { %v3258_v30 = vpop.f32.mrf.mxu1  ;;  %v3217_v32 = vpop.f32.mrf.mxu0 }
 0x1c3   :  { %v3259_v5 = vadd.f32 %v3258_v30, %v3257_v27  ;;  %v3218_v8 = vadd.f32 %v3217_v32, %v3216_v28 }
 0x1c5   :  { %v1493_v26 = vadd.f32 %v3259_v5, %v1408_v3  ;;  %v1413_v17 = vadd.f32 %v3218_v8, %v1328_v62 }
 0x1c6   :  { %v3260_v11 = vpop.f32.mrf.mxu1  ;;  %v3219_v33 = vpop.f32.mrf.mxu0 }
 0x1c8   :  { %v3261_v35 = vpop.f32.mrf.mxu1  ;;  %v3220_v37 = vpop.f32.mrf.mxu0 }
 0x1c9   :  { %v3262_v7 = vadd.f32 %v3261_v35, %v3260_v11  ;;  %v3221_v6 = vadd.f32 %v3220_v37, %v3219_v33 }
 0x1cb   :  { %v1498_v20 = vadd.f32 %v3262_v7, %v1413_v17  ;;  %v4996_v17 = vld [vmem:[%s5239_s4 + $0x70] sm:$0xff] }
 0x1cc   :  { %v4969_v38 = vpop.f32.mrf.mxu1 }
 0x1ce   :  { %v3264_v31 = vpop.f32.mrf.mxu1 }
 0x1cf   :  { %v3265_v5 = vadd.f32 %v3264_v31, %v4969_v38 }
 0x1dd   :  { %v3298_v39 = vpop.f32.mrf.mxu0 }
 0x1df   :  { %v3299_v29 = vpop.f32.mrf.mxu0 }
 0x1e0   :  { %v3300_v59 = vadd.f32 %v3299_v29, %v3298_v39  ;;  %v1333_v39 = vadd.f32 %v3177_v24, %v3133_v15  ;;  %v4991_v15 = vld [vmem:[%s5239_s4 + $0x78] sm:$0xff] }
 0x1e2   :  { %v3342_v18 = vpop.f32.mrf.mxu1  ;;  %v3301_v40 = vpop.f32.mrf.mxu0  ;;  %v1573_v21 = vadd.f32 %v3300_v59, %v1488_v61 }
 0x1e4   :  { %v3343_v41 = vpop.f32.mrf.mxu1  ;;  %v3302_v42 = vpop.f32.mrf.mxu0 }
 0x1e5   :  { %v3344_v4 = vadd.f32 %v3343_v41, %v3342_v18  ;;  %v3303_v10 = vadd.f32 %v3302_v42, %v3301_v40  ;;  %v1418_v40 = vadd.f32 %v3221_v6, %v1333_v39  ;;  %v5003_v6 = vld [vmem:[%s5239_s4 + $0x68] sm:$0xff] }
 0x1e7   :  { %v1658_v12 = vadd.f32 %v3344_v4, %v1573_v21  ;;  %v1578_v0 = vadd.f32 %v3303_v10, %v1493_v26  ;;  %v3059_v4 = vld [vmem:[%s5240_s5] ss:$0 sm:$0xff] }
 0x1e8   :  { %v3345_v23 = vpop.f32.mrf.mxu1  ;;  %v3304_v43 = vpop.f32.mrf.mxu0 }
 0x1ea   :  { %v3346_v44 = vpop.f32.mrf.mxu1  ;;  %v3305_v46 = vpop.f32.mrf.mxu0 }
 0x1eb   :  { %v3347_v14 = vadd.f32 %v3346_v44, %v3345_v23  ;;  %v3306_v27 = vadd.f32 %v3305_v46, %v3304_v43  ;;  %v1503_v46 = vadd.f32 %v3265_v5, %v1418_v40  ;;  %v5262_v5 = vld [vmem:[#allocation6_spill] sm:$0xff] }
 0x1ed   :  { %v1663_v35 = vadd.f32 %v3347_v14, %v1578_v0  ;;  %v1583_v16 = vadd.f32 %v3306_v27, %v1498_v20  ;;  %v5010_v27 = vld [vmem:[%s5239_s4 + $0x60] sm:$0xff] }
 0x1ee   :  { %v3348_v47 = vpop.f32.mrf.mxu1  ;;  %v3307_v34 = vpop.f32.mrf.mxu0 }
 0x1f0   :  { %v3349_v49 = vpop.f32.mrf.mxu1  ;;  %v3308_v54 = vpop.f32.mrf.mxu0 }
 0x1f1   :  { %v3350_v29 = vadd.f32 %v3349_v49, %v3348_v47  ;;  %v3309_v37 = vadd.f32 %v3308_v54, %v3307_v34 }
 0x1f3   :  { %v1668_v48 = vadd.f32 %v3350_v29, %v1583_v16  ;;  %v1588_v31 = vadd.f32 %v3309_v37, %v1503_v46  ;;  %v5264_v29 = vld [vmem:[#allocation8_spill] sm:$0xff] }
 0x1f4   :  { %v3351_v55 = vpop.f32.mrf.mxu1 }
 0x1f6   :  { %v3352_v58 = vpop.f32.mrf.mxu1 }
 0x1f7   :  { %v3353_v36 = vadd.f32 %v3352_v58, %v3351_v55  ;;  %v5260_v58 = vmov 0.0  }
 0x1f9   :  { %v1673_v56 = vadd.f32 %v3353_v36, %v1588_v31 }
 0x205   :  { %v3386_v2 = vpop.f32.mrf.mxu0 }
 0x207   :  { %v3387_v1 = vpop.f32.mrf.mxu0 }
 0x208   :  { %v3388_v13 = vadd.f32 %v3387_v1, %v3386_v2 }
 0x209   :  { %v3389_v9 = vpop.f32.mrf.mxu0  ;;  %v3430_v25 = vpop.f32.mrf.mxu1 }
 0x20a   :  { %v1743_v61 = vadd.f32 %v3388_v13, %v1658_v12 }
 0x20b   :  { %v3390_v28 = vpop.f32.mrf.mxu0  ;;  %v3431_v30 = vpop.f32.mrf.mxu1 }
 0x20c   :  { %v3391_v32 = vadd.f32 %v3390_v28, %v3389_v9  ;;  %v3432_v2 = vadd.f32 %v3431_v30, %v3430_v25  ;;  %v5017_v28 = vld [vmem:[%s5239_s4 + $0x58] sm:$0xff]  ;;  %v5024_v30 = vld [vmem:[%s5239_s4 + $0x50] sm:$0xff] }
 0x20d   :  { %v3392_v22 = vpop.f32.mrf.mxu0  ;;  %v3433_v11 = vpop.f32.mrf.mxu1 }
 0x20e   :  { %v1828_v18 = vadd.f32 %v3432_v2, %v1743_v61  ;;  %v1748_v41 = vadd.f32 %v3391_v32, %v1663_v35  ;;  %v5031_v61 = vld [vmem:[%s5239_s4 + $0x48] sm:$0xff]  ;;  %v5041_v32 = vld [vmem:[%s5239_s4 + $0x40] sm:$0xff]  ;;  %v5263_v35 = vld [vmem:[#allocation7_spill] sm:$0xff] }
 0x20f   :  { %v3393_v19 = vpop.f32.mrf.mxu0  ;;  %v3434_v33 = vpop.f32.mrf.mxu1 }
 0x210   :  { %v3394_v42 = vadd.f32 %v3393_v19, %v3392_v22  ;;  %v3435_v23 = vadd.f32 %v3434_v33, %v3433_v11  ;;  %1846 = vxpose.xlu0.b32.start [1/4] (short) (narrow) %v1828_v18, 8  ;;  %v5261_v11 = vld [vmem:[#allocation5_spill] sm:$0xff]  ;;  %v5080_v18 = vld [vmem:[%s5240_s5 + $0x1] ss:$0 sm:$0xff] }
 0x211   :  { %v3395_v43 = vpop.f32.mrf.mxu0  ;;  %v3436_v44 = vpop.f32.mrf.mxu1 }
 0x212   :  { %v1833_v50 = vadd.f32 %v3435_v23, %v1748_v41  ;;  %v1753_v47 = vadd.f32 %v3394_v42, %v1668_v48 }
 0x213   :  { %v3396_v51 = vpop.f32.mrf.mxu0  ;;  %v3437_v38 = vpop.f32.mrf.mxu1 }
 0x214   :  { %v3397_v49 = vadd.f32 %v3396_v51, %v3395_v43  ;;  %v3438_v52 = vadd.f32 %v3437_v38, %v3436_v44  ;;  %1847 = vxpose.xlu0.b32.cont [2/4] (short) (narrow) %v1833_v50, 8 }
 0x215   :  { %v3439_v53 = vpop.f32.mrf.mxu1 }
 0x216   :  { %v1838_v34 = vadd.f32 %v3438_v52, %v1753_v47  ;;  %v1758_v57 = vadd.f32 %v3397_v49, %v1673_v56 }
 0x217   :  { %v3440_v54 = vpop.f32.mrf.mxu1 }
 0x218   :  { %v3441_v45 = vadd.f32 %v3440_v54, %v3439_v53  ;;  %1848 = vxpose.xlu0.b32.cont [3/4] (short) (narrow) %v1838_v34, 8 }
 0x219   :  { %v2047_v55 = vpop.f32.mrf.mxu1 }
 0x21a   :  { %v1843_v59 = vadd.f32 %v3441_v45, %v1758_v57 }
 0x21b   :  { %v3534_v63 = vpop.f32.mrf.mxu1 }
 0x21c   :  { %1849 = vxpose.xlu0.b32.end [4/4] (short) (narrow) %v1843_v59, 8 }
 0x28c   :  { %v1862_v60 = vpop.trf.xlu0 }
 0x28d   :  { %3522 = vmatmul.mubr.msk.f32.vlgmr.msra.gmra.mxu0 %vm1893_vm3, %v1862_v60 }
 0x28e   :  { %3551 = vmatprep.mubr.msk.f32.mxu0 %vm3772_vm2, %v5260_v58  ;;  %3536 = vmatpush3.msra.mxu0 %v4991_v15 }
 0x28f   :  { %3537 = vmatprep.subr.mxu0 %v5260_v58 }
 0x290   :  { %3538 = vmatpush3.msra.mxu0 %v4996_v17 }
 0x291   :  { %3539 = vmatprep.subr.mxu0 %v5260_v58 }
 0x292   :  { %3540 = vmatpush3.msra.mxu0 %v5003_v6 }
 0x293   :  { %3541 = vmatprep.subr.mxu0 %v5260_v58 }
 0x294   :  { %3542 = vmatpush3.msra.mxu0 %v5010_v27 }
 0x295   :  { %3543 = vmatprep.subr.mxu0 %v5260_v58 }
 0x296   :  { %3544 = vmatpush3.msra.mxu0 %v5017_v28 }
 0x297   :  { %3545 = vmatprep.subr.mxu0 %v5260_v58 }
 0x298   :  { %3546 = vmatpush3.msra.mxu0 %v5024_v30 }
 0x299   :  { %3547 = vmatprep.subr.mxu0 %v5260_v58 }
 0x29a   :  { %3548 = vmatpush3.msra.mxu0 %v5031_v61 }
 0x29b   :  { %3549 = vmatprep.subr.mxu0 %v5260_v58 }
 0x29c   :  { %3550 = vmatpush3.msra.mxu0 %v5041_v32 }
 0x29d   :  { %3584 = vmatprep.subr.mxu0 %v5260_v58 }
 0x34d   :  { %v1963_v8 = vpop.f32.mrf.mxu0 }
 0x34e   :  { %v4980_v1 = vadd.f32 %v3059_v4, %v1963_v8 }
 0x34f   :  { %v3523_v3 = vpop.f32.mrf.mxu0 }
 0x350   :  { %v2051_v21 = vadd.f32 %v2047_v55, %v4980_v1 }
 0x352   :  { %3684 = vtanh.f32 %v2051_v21  ;;  %v3070_v13 = vmul.f32 -1.442695, %v2051_v21 }
 0x354   :  { %3686 = vpow2.f32 %v3070_v13 }
 0x35f   :  { %v3685_v10 = vpop.eup %3684 }
 0x360   :  { %2061 = vrot.lane.b32.xlu1 %v3685_v10, %s3773_s0 }
 0x361   :  { %v3687_v62 = vpop.eup %3686 }
 0x362   :  { %v2055_v24 = vadd.f32 1.0, %v3687_v62 }
 0x364   :  { %3688 = vrcp.f32 %v2055_v24 }
 0x371   :  { %v3689_v7 = vpop.eup %3688 }
 0x372   :  { %v2059_v26 = vmul.f32 0.0, %v3689_v7 }
 0x3d2   :  { %v2062_v9 = vpop.permute.xlu1 %2061 }
 0x3d3   :  { %v2064_v25 = vmul.f32 %v3689_v7, %v2062_v9 }
 0x3d5   :  { %2066 = vrot.lane.b32.xlu1 %v2064_v25, %s3774_s3 }
 0x447   :  { %v2067_v12 = vpop.permute.xlu1 %2066 }
 0x448   :  { %v4985_v14 = vadd.f32 %v2067_v12, %v2059_v26 }
 0x44a   :  { %3690 = vtanh.f32 %v4985_v14  ;;  %v2269_v54 = vrot.slane %v4985_v14, 6 }
 0x457   :  { %v3691_v0 = vpop.eup %3690 }
 0x458   :  { %2072 = vrot.lane.b32.xlu1 %v3691_v0, %s3773_s0 }
 0x4ca   :  { %v2073_v2 = vpop.permute.xlu1 %2072 }
 0x4cb   :  { %v2075_v39 = vmul.f32 %v3689_v7, %v2073_v2 }
 0x4cd   :  { %2077 = vrot.lane.b32.xlu1 %v2075_v39, %s3774_s3 }
 0x53f   :  { %v2078_v20 = vpop.permute.xlu1 %2077 }
 0x540   :  { %v2080_v22 = vsel %vm1893_vm3, %v2078_v20, 0.0  ;;  %3563 = vmatmul.mubr.msk.f32.vlgmr.msra.gmra.mxu1 %vm1893_vm3, %v2078_v20 }
 0x541   :  { %3552 = vmatmul.mubr.msk.f32.vlgmr.msra.gmra.mxu0 %vm2087_vm4, %v2080_v22  ;;  %3566 = vmatpush3.msra.mxu1 %v4991_v15 }
 0x542   :  { %3567 = vmatprep.subr.mxu1 %v5260_v58  ;;  %3585 = vmatpush3.msra.mxu0 %v5261_v11 }
 0x543   :  { %3568 = vmatpush3.msra.mxu1 %v4996_v17  ;;  %3586 = vmatprep.subr.mxu0 %v5260_v58 }
 0x544   :  { %3569 = vmatprep.subr.mxu1 %v5260_v58  ;;  %3587 = vmatpush3.msra.mxu0 %v5262_v5 }
 0x545   :  { %3570 = vmatpush3.msra.mxu1 %v5003_v6  ;;  %3588 = vmatprep.subr.mxu0 %v5260_v58 }
 0x546   :  { %3571 = vmatprep.subr.mxu1 %v5260_v58  ;;  %3589 = vmatpush3.msra.mxu0 %v5263_v35 }
 0x547   :  { %3572 = vmatpush3.msra.mxu1 %v5010_v27  ;;  %3581 = vmatprep.mubr.msk.f32.mxu1 %vm3772_vm2, %v5260_v58 }
 0x548   :  { %3573 = vmatprep.subr.mxu1 %v5260_v58  ;;  %3590 = vmatprep.subr.mxu0 %v5260_v58 }
 0x549   :  { %3574 = vmatpush3.msra.mxu1 %v5017_v28  ;;  %3591 = vmatpush3.msra.mxu0 %v5264_v29 }
 0x54a   :  { %3575 = vmatprep.subr.mxu1 %v5260_v58  ;;  %3592 = vmatprep.mubr.msk.f32.mxu0 %vm3772_vm2, %v5260_v58 }
 0x54b   :  { %3576 = vmatpush3.msra.mxu1 %v5024_v30  ;;  %3595 = vmatprep.subr.mxu0 %v5260_v58 }
 0x54c   :  { %3577 = vmatprep.subr.mxu1 %v5260_v58 }
 0x54d   :  { %3578 = vmatpush3.msra.mxu1 %v5031_v61 }
 0x54e   :  { %3579 = vmatprep.subr.mxu1 %v5260_v58 }
 0x54f   :  { %3580 = vmatpush3.msra.mxu1 %v5041_v32 }
 0x550   :  { %3614 = vmatprep.subr.mxu1 %v5260_v58 }
 0x600   :  { %v2253_v40 = vpop.f32.mrf.mxu1 }
 0x601   :  { %v2258_v16 = vrot.slane %v2253_v40, 6  ;;  %v2157_v19 = vpop.f32.mrf.mxu0 }
 0x602   :  { %v2158_v33 = vadd.f32 %v5080_v18, %v2157_v19  ;;  %v3564_v37 = vpop.f32.mrf.mxu1 }
 0x603   :  { %v3553_v41 = vpop.f32.mrf.mxu0  ;;  %v2260_v42 = vadd.f32 %v2258_v16, %v4980_v1 }
 0x604   :  { %3692 = vtanh.f32 %v2158_v33  ;;  %v3073_v44 = vmul.f32 -1.442695, %v2158_v33 }
 0x605   :  { %3694 = vtanh.f32 %v2260_v42  ;;  %v3075_v46 = vmul.f32 -1.442695, %v2260_v42 }
 0x606   :  { %3696 = vpow2.f32 %v3073_v44 }
 0x607   :  { %3698 = vpow2.f32 %v3075_v46 }
 0x611   :  { %v3693_v23 = vpop.eup %3692 }
 0x612   :  { %2170 = vrot.lane.b32.xlu1 %v3693_v23, %s3773_s0  ;;  %v3695_v43 = vpop.eup %3694 }
 0x613   :  { %v3697_v48 = vpop.eup %3696 }
 0x614   :  { %v2164_v36 = vadd.f32 1.0, %v3697_v48  ;;  %v3699_v50 = vpop.eup %3698 }
 0x615   :  { %v2264_v51 = vadd.f32 1.0, %v3699_v50 }
 0x616   :  { %2273 = vrot.lane.b32.xlu1 %v3695_v43, %s3773_s0  ;;  %3700 = vrcp.f32 %v2164_v36 }
 0x617   :  { %3702 = vrcp.f32 %v2264_v51 }
 0x623   :  { %v3701_v38 = vpop.eup %3700 }
 0x624   :  { %v3703_v49 = vpop.eup %3702  ;;  %v2168_v56 = vmul.f32 0.0, %v3701_v38 }
 0x625   :  { %v2271_v45 = vmul.f32 %v3703_v49, %v2269_v54 }
 0x684   :  { %v2171_v31 = vpop.permute.xlu1 %2170 }
 0x685   :  { %v2173_v47 = vmul.f32 %v3701_v38, %v2171_v31 }
 0x687   :  { %2175 = vrot.lane.b32.xlu1 %v2173_v47, %s3774_s3 }
 0x688   :  { %v2274_v52 = vpop.permute.xlu1 %2273 }
 0x689   :  { %v2276_v53 = vmul.f32 %v3703_v49, %v2274_v52 }
 0x68b   :  { %2278 = vrot.lane.b32.xlu1 %v2276_v53, %s3774_s3 }
 0x6f9   :  { %v2176_v34 = vpop.permute.xlu1 %2175 }
 0x6fa   :  { %v5089_v57 = vadd.f32 %v2176_v34, %v2168_v56 }
 0x6fc   :  { %3704 = vtanh.f32 %v5089_v57 }
 0x6fd   :  { %v2279_v59 = vpop.permute.xlu1 %2278 }
 0x6fe   :  { %v5092_v60 = vadd.f32 %v2279_v59, %v2271_v45 }
 0x700   :  { %3706 = vtanh.f32 %v5092_v60  ;;  %v2483_v48 = vrot.slane %v5092_v60, 6 }
 0x709   :  { %v3705_v55 = vpop.eup %3704 }
 0x70a   :  { %2181 = vrot.lane.b32.xlu1 %v3705_v55, %s3773_s0 }
 0x70d   :  { %v3707_v63 = vpop.eup %3706 }
 0x70e   :  { %2284 = vrot.lane.b32.xlu1 %v3707_v63, %s3773_s0 }
 0x77c   :  { %v2182_v4 = vpop.permute.xlu1 %2181 }
 0x77d   :  { %v2184_v8 = vmul.f32 %v3701_v38, %v2182_v4 }
 0x77f   :  { %v2293_v3 = vrot.slane %v2184_v8, 6 }
 0x780   :  { %v2285_v21 = vpop.permute.xlu1 %2284 }
 0x781   :  { %v2287_v10 = vmul.f32 %v3703_v49, %v2285_v21  ;;  %2294 = vrot.lane.b32.xlu0 %v2293_v3, %s3773_s0 }
 0x783   :  { %2289 = vrot.lane.b32.xlu1 %v2287_v10, %s3774_s3  ;;  %v2396_v13 = vrot.slane %v2287_v10, 2 }
 0x787   :  { %2397 = vrot.lane.b32.xlu1 %v2396_v13, %s3774_s3 }
 0x7f3   :  { %v2295_v62 = vpop.permute.xlu0 %2294 }
 0x7f5   :  { %v2290_v24 = vpop.permute.xlu1 %2289 }
 0x7f6   :  { %v2297_v7 = vsel %vm1893_vm3, %v2290_v24, %v2295_v62 }
 0x7f7   :  { %v2299_v9 = vrot.slane %v2297_v7, 2 }
 0x7f9   :  { %3582 = vmatmul.mubr.msk.f32.vlgmr.msra.gmra.mxu1 %vm2087_vm4, %v2299_v9  ;;  %v2398_v25 = vpop.permute.xlu1 %2397 }
 0x7fa   :  { %3593 = vmatmul.mubr.msk.f32.vlgmr.msra.gmra.mxu0 %vm1893_vm3, %v2398_v25  ;;  %3615 = vmatpush3.msra.mxu1 %v5261_v11 }
 0x7fb   :  { %3596 = vmatpush3.msra.mxu0 %v4991_v15  ;;  %3616 = vmatprep.subr.mxu1 %v5260_v58 }
 0x7fc   :  { %3597 = vmatprep.subr.mxu0 %v5260_v58  ;;  %3617 = vmatpush3.msra.mxu1 %v5262_v5 }
 0x7fd   :  { %3598 = vmatpush3.msra.mxu0 %v4996_v17  ;;  %3618 = vmatprep.subr.mxu1 %v5260_v58 }
 0x7fe   :  { %3599 = vmatprep.subr.mxu0 %v5260_v58  ;;  %3619 = vmatpush3.msra.mxu1 %v5263_v35 }
 0x7ff   :  { %3600 = vmatpush3.msra.mxu0 %v5003_v6  ;;  %3611 = vmatprep.mubr.msk.f32.mxu0 %vm3772_vm2, %v5260_v58 }
 0x800   :  { %3601 = vmatprep.subr.mxu0 %v5260_v58  ;;  %3620 = vmatprep.subr.mxu1 %v5260_v58 }
 0x801   :  { %3602 = vmatpush3.msra.mxu0 %v5010_v27  ;;  %3621 = vmatpush3.msra.mxu1 %v5264_v29 }
 0x802   :  { %3603 = vmatprep.subr.mxu0 %v5260_v58  ;;  %3622 = vmatprep.mubr.msk.f32.mxu1 %vm3772_vm2, %v5260_v58 }
 0x803   :  { %3604 = vmatpush3.msra.mxu0 %v5017_v28  ;;  %3625 = vmatprep.subr.mxu1 %v5260_v58 }
 0x804   :  { %3605 = vmatprep.subr.mxu0 %v5260_v58 }
 0x805   :  { %3606 = vmatpush3.msra.mxu0 %v5024_v30 }
 0x806   :  { %3607 = vmatprep.subr.mxu0 %v5260_v58 }
 0x807   :  { %3608 = vmatpush3.msra.mxu0 %v5031_v61 }
 0x808   :  { %3609 = vmatprep.subr.mxu0 %v5260_v58 }
 0x809   :  { %3610 = vmatpush3.msra.mxu0 %v5041_v32 }
 0x80a   :  { %3644 = vmatprep.subr.mxu0 %v5260_v58 }
 0x8b9   :  { %v2368_v26 = vpop.f32.mrf.mxu1 }
 0x8ba   :  { %v2369_v12 = vadd.f32 %v5080_v18, %v2368_v26  ;;  %v2467_v14 = vpop.f32.mrf.mxu0 }
 0x8bb   :  { %v2472_v0 = vrot.slane %v2467_v14, 4  ;;  %v3583_v2 = vpop.f32.mrf.mxu1 }
 0x8bc   :  { %3708 = vtanh.f32 %v2369_v12  ;;  %v3594_v39 = vpop.f32.mrf.mxu0  ;;  %v3077_v5 = vmul.f32 -1.442695, %v2369_v12 }
 0x8bd   :  { %v2474_v20 = vadd.f32 %v2472_v0, %v4980_v1 }
 0x8bf   :  { %3710 = vtanh.f32 %v2474_v20  ;;  %v3079_v35 = vmul.f32 -1.442695, %v2474_v20 }
 0x8c0   :  { %3712 = vpow2.f32 %v3077_v5 }
 0x8c1   :  { %3714 = vpow2.f32 %v3079_v35 }
 0x8c9   :  { %v3709_v22 = vpop.eup %3708 }
 0x8ca   :  { %2381 = vrot.lane.b32.xlu1 %v3709_v22, %s3773_s0 }
 0x8cc   :  { %v3711_v11 = vpop.eup %3710 }
 0x8cd   :  { %v3713_v29 = vpop.eup %3712 }
 0x8ce   :  { %2487 = vrot.lane.b32.xlu1 %v3711_v11, %s3773_s0  ;;  %v2375_v40 = vadd.f32 1.0, %v3713_v29  ;;  %v3715_v16 = vpop.eup %3714 }
 0x8cf   :  { %v2478_v19 = vadd.f32 1.0, %v3715_v16 }
 0x8d0   :  { %3716 = vrcp.f32 %v2375_v40 }
 0x8d1   :  { %3718 = vrcp.f32 %v2478_v19 }
 0x8dd   :  { %v3717_v33 = vpop.eup %3716 }
 0x8de   :  { %v3719_v42 = vpop.eup %3718  ;;  %v2379_v44 = vmul.f32 %v3717_v33, %v5089_v57 }
 0x8df   :  { %v2485_v50 = vmul.f32 %v3719_v42, %v2483_v48 }
 0x93c   :  { %v2382_v37 = vpop.permute.xlu1 %2381 }
 0x93d   :  { %v2384_v41 = vmul.f32 %v3717_v33, %v2382_v37 }
 0x93f   :  { %2386 = vrot.lane.b32.xlu1 %v2384_v41, %s3774_s3 }
 0x940   :  { %v2488_v23 = vpop.permute.xlu1 %2487 }
 0x941   :  { %v2490_v43 = vmul.f32 %v3719_v42, %v2488_v23 }
 0x943   :  { %2492 = vrot.lane.b32.xlu1 %v2490_v43, %s3774_s3 }
 0x9b1   :  { %v2387_v46 = vpop.permute.xlu1 %2386 }
 0x9b2   :  { %v5139_v36 = vadd.f32 %v2387_v46, %v2379_v44 }
 0x9b4   :  { %3720 = vtanh.f32 %v5139_v36 }
 0x9b5   :  { %v2493_v51 = vpop.permute.xlu1 %2492 }
 0x9b6   :  { %v5142_v38 = vadd.f32 %v2493_v51, %v2485_v50 }
 0x9b8   :  { %3722 = vtanh.f32 %v5142_v38  ;;  %v2697_v12 = vrot.slane %v5142_v38, 6 }
 0x9c1   :  { %v3721_v31 = vpop.eup %3720 }
 0x9c2   :  { %2392 = vrot.lane.b32.xlu1 %v3721_v31, %s3773_s0 }
 0x9c5   :  { %v3723_v47 = vpop.eup %3722 }
 0x9c6   :  { %2498 = vrot.lane.b32.xlu1 %v3723_v47, %s3773_s0 }
 0xa34   :  { %v2393_v49 = vpop.permute.xlu1 %2392 }
 0xa35   :  { %v2395_v53 = vmul.f32 %v3717_v33, %v2393_v49 }
 0xa37   :  { %v2507_v34 = vrot.slane %v2395_v53, 4  ;;  %v2825_v53 = vld [vmem:[%s5241_s6 + $0x8] sm:$0xff] }
 0xa38   :  { %v2499_v52 = vpop.permute.xlu1 %2498 }
 0xa39   :  { %v2501_v56 = vmul.f32 %v3719_v42, %v2499_v52  ;;  %v2826_v52 = vld [vmem:[%s5241_s6 + $0x10] sm:$0xff] }
 0xa3b   :  { %2503 = vrot.lane.b32.xlu1 %v2501_v56, %s3774_s3  ;;  %v2610_v54 = vrot.slane %v2501_v56, 4  ;;  %v2824_v56 = vld [vmem:[%s5241_s6] sm:$0xff] }
 0xa3f   :  { %2508 = vrot.lane.b32.xlu1 %v2507_v34, %s3773_s0 }
 0xa43   :  { %2611 = vrot.lane.b32.xlu1 %v2610_v54, %s3774_s3 }
 0xaad   :  { %v2504_v57 = vpop.permute.xlu1 %2503 }
 0xab1   :  { %v2509_v45 = vpop.permute.xlu1 %2508 }
 0xab2   :  { %v2511_v59 = vsel %vm1893_vm3, %v2504_v57, %v2509_v45  ;;  %v2914_v45 = vld [vmem:[%s5243_s8 + $0x18] sm:$0xff] }
 0xab3   :  { %v2513_v60 = vrot.slane %v2511_v59, 4 }
 0xab5   :  { %3612 = vmatmul.mubr.msk.f32.vlgmr.msra.gmra.mxu0 %vm2087_vm4, %v2513_v60  ;;  %v2612_v55 = vpop.permute.xlu1 %2611  ;;  %v2913_v60 = vld [vmem:[%s5243_s8 + $0x10] sm:$0xff] }
 0xab6   :  { %3623 = vmatmul.mubr.msk.f32.vlgmr.msra.gmra.mxu1 %vm1893_vm3, %v2612_v55  ;;  %3652 = vmatprep.mubr.msk.f32.mxu0 %vm3772_vm2, %v5260_v58  ;;  %v2912_v55 = vld [vmem:[%s5243_s8 + $0x8] sm:$0xff] }
 0xab7   :  { %3626 = vmatpush3.msra.mxu1 %v4991_v15  ;;  %3641 = vmatprep.mubr.msk.f32.mxu1 %vm3772_vm2, %v5260_v58 }
 0xab8   :  { %3627 = vmatprep.subr.mxu1 %v5260_v58 }
 0xab9   :  { %3628 = vmatpush3.msra.mxu1 %v4996_v17 }
 0xaba   :  { %3629 = vmatprep.subr.mxu1 %v5260_v58 }
 0xabb   :  { %3630 = vmatpush3.msra.mxu1 %v5003_v6 }
 0xabc   :  { %3631 = vmatprep.subr.mxu1 %v5260_v58 }
 0xabd   :  { %3632 = vmatpush3.msra.mxu1 %v5010_v27 }
 0xabe   :  { %3633 = vmatprep.subr.mxu1 %v5260_v58 }
 0xabf   :  { %3634 = vmatpush3.msra.mxu1 %v5017_v28 }
 0xac0   :  { %3635 = vmatprep.subr.mxu1 %v5260_v58 }
 0xac1   :  { %3636 = vmatpush3.msra.mxu1 %v5024_v30 }
 0xac2   :  { %3637 = vmatprep.subr.mxu1 %v5260_v58 }
 0xac3   :  { %3638 = vmatpush3.msra.mxu1 %v5031_v61 }
 0xac4   :  { %3639 = vmatprep.subr.mxu1 %v5260_v58 }
 0xac5   :  { %3640 = vmatpush3.msra.mxu1 %v5041_v32 }
 0xb75   :  { %v2582_v15 = vpop.f32.mrf.mxu0 }
 0xb76   :  { %v2583_v17 = vadd.f32 %v5080_v18, %v2582_v15  ;;  %v2681_v6 = vpop.f32.mrf.mxu1  ;;  %v2911_v15 = vld [vmem:[%s5243_s8] sm:$0xff]  ;;  %s3748_s8 = scalar_lea.vmem %s3004_s15, 32 }
 0xb77   :  { %v2686_v27 = vrot.slane %v2681_v6, 2  ;;  %v3613_v63 = vpop.f32.mrf.mxu0  ;;  %p3749_p0 = scmp.ne.s32.totalorder %s3004_s15, %s3748_s8  ;;  %p3754_p2 = scmp.lt.s32.totalorder %s3748_s8, %s3748_s8 }
 0xb78   :  { %3724 = vtanh.f32 %v2583_v17  ;;  %v3624_v28 = vpop.f32.mrf.mxu1  ;;  %v3081_v61 = vmul.f32 -1.442695, %v2583_v17  ;;  %v3086_v17 = vld [vmem:[%s5242_s7] ss:$0 sm:$0xff] }
 0xb79   :  { %v2688_v4 = vadd.f32 %v2686_v27, %v4980_v1  ;;  %p3755_p3 = por %p3754_p2, %p3753_p1 }
 0xb7b   :  { %3726 = vtanh.f32 %v2688_v4  ;;  %v3083_v3 = vmul.f32 -1.442695, %v2688_v4  ;;  %v3088_v4 = vld [vmem:[%s5244_s9] ss:$0 sm:$0xff]  ;;  %p3756_p4 = pnand %p3755_p3, %p3749_p0 }
 0xb7c   :  { %3728 = vpow2.f32 %v3081_v61 }
 0xb7d   :  { %3730 = vpow2.f32 %v3083_v3 }
 0xb85   :  { %v3725_v30 = vpop.eup %3724 }
 0xb86   :  { %2595 = vrot.lane.b32.xlu0 %v3725_v30, %s3773_s0 }
 0xb88   :  { %v3727_v8 = vpop.eup %3726 }
 0xb89   :  { %2701 = vrot.lane.b32.xlu1 %v3727_v8, %s3773_s0  ;;  %v3729_v32 = vpop.eup %3728 }
 0xb8a   :  { %v3731_v21 = vpop.eup %3730  ;;  %v2589_v10 = vadd.f32 1.0, %v3729_v32 }
 0xb8b   :  { %v2692_v13 = vadd.f32 1.0, %v3731_v21 }
 0xb8c   :  { %3732 = vrcp.f32 %v2589_v10 }
 0xb8d   :  { %3734 = vrcp.f32 %v2692_v13 }
 0xb99   :  { %v3733_v62 = vpop.eup %3732 }
 0xb9a   :  { %v3735_v7 = vpop.eup %3734  ;;  %v2593_v26 = vmul.f32 %v3733_v62, %v5139_v36 }
 0xb9b   :  { %v2699_v2 = vmul.f32 %v3735_v7, %v2697_v12 }
 0xbf8   :  { %v2596_v24 = vpop.permute.xlu0 %2595 }
 0xbf9   :  { %v2598_v1 = vmul.f32 %v3733_v62, %v2596_v24 }
 0xbfb   :  { %v2702_v9 = vpop.permute.xlu1 %2701  ;;  %2600 = vrot.lane.b32.xlu0 %v2598_v1, %s3774_s3 }
 0xbfc   :  { %v2704_v25 = vmul.f32 %v3735_v7, %v2702_v9 }
 0xbfe   :  { %2706 = vrot.lane.b32.xlu1 %v2704_v25, %s3774_s3 }
 0xc6d   :  { %v2601_v14 = vpop.permute.xlu0 %2600 }
 0xc6e   :  { %v2603_v0 = vadd.f32 %v2601_v14, %v2593_v26 }
 0xc70   :  { %3736 = vtanh.f32 %v2603_v0  ;;  %v2707_v39 = vpop.permute.xlu1 %2706 }
 0xc71   :  { %v2709_v20 = vadd.f32 %v2707_v39, %v2699_v2 }
 0xc73   :  { %3738 = vtanh.f32 %v2709_v20 }
 0xc7d   :  { %v3737_v22 = vpop.eup %3736 }
 0xc7e   :  { %2606 = vrot.lane.b32.xlu0 %v3737_v22, %s3773_s0 }
 0xc80   :  { %v3739_v11 = vpop.eup %3738 }
 0xc81   :  { %2712 = vrot.lane.b32.xlu1 %v3739_v11, %s3773_s0 }
 0xcf0   :  { %v2607_v5 = vpop.permute.xlu0 %2606 }
 0xcf1   :  { %v2609_v35 = vmul.f32 %v3733_v62, %v2607_v5 }
 0xcf3   :  { %v2721_v29 = vrot.slane %v2609_v35, 2  ;;  %v2713_v40 = vpop.permute.xlu1 %2712 }
 0xcf4   :  { %v2715_v16 = vmul.f32 %v3735_v7, %v2713_v40 }
 0xcf5   :  { %2722 = vrot.lane.b32.xlu1 %v2721_v29, %s3773_s0 }
 0xcf6   :  { %2717 = vrot.lane.b32.xlu0 %v2715_v16, %s3774_s3 }
 0xd67   :  { %v2723_v19 = vpop.permute.xlu1 %2722 }
 0xd68   :  { %v2718_v33 = vpop.permute.xlu0 %2717 }
 0xd69   :  { %v2725_v37 = vsel %vm1893_vm3, %v2718_v33, %v2723_v19 }
 0xd6a   :  { %v2727_v41 = vrot.slane %v2725_v37, 6 }
 0xd6c   :  { %3642 = vmatmul.mubr.msk.f32.vlgmr.msra.gmra.mxu1 %vm2087_vm4, %v2727_v41 }
 0xe2c   :  { %v2796_v42 = vpop.f32.mrf.mxu1 }
 0xe2d   :  { %v2797_v23 = vadd.f32 %v5080_v18, %v2796_v42  ;;  %v2827_v18 = vld [vmem:[%s5241_s6 + $0x18] sm:$0xff] }
 0xe2e   :  { %v3643_v43 = vpop.f32.mrf.mxu1  ;;  %3645 = vmatpush3.msra.mxu0 %v2827_v18 }
 0xe2f   :  { %3740 = vtanh.f32 %v2797_v23  ;;  %v3085_v46 = vmul.f32 -1.442695, %v2797_v23  ;;  %3646 = vmatprep.subr.mxu0 %v5260_v58 }
 0xe30   :  { %3647 = vmatpush3.msra.mxu0 %v2826_v52 }
 0xe31   :  { %3742 = vpow2.f32 %v3085_v46  ;;  %3648 = vmatprep.subr.mxu0 %v5260_v58 }
 0xe32   :  { %3649 = vmatpush3.msra.mxu0 %v2825_v53 }
 0xe33   :  { %3650 = vmatprep.subr.mxu0 %v5260_v58 }
 0xe34   :  { %3651 = vmatpush3.msra.mxu0 %v2824_v56 }
 0xe35   :  { %3655 = vmatprep.subr.mxu0 %v5260_v58 }
 0xe3c   :  { %v3741_v44 = vpop.eup %3740 }
 0xe3d   :  { %2809 = vrot.lane.b32.xlu0 %v3741_v44, %s3773_s0 }
 0xe3e   :  { %v3743_v48 = vpop.eup %3742 }
 0xe3f   :  { %v2803_v36 = vadd.f32 1.0, %v3743_v48 }
 0xe41   :  { %3744 = vrcp.f32 %v2803_v36 }
 0xe4e   :  { %v3745_v50 = vpop.eup %3744 }
 0xe4f   :  { %v2807_v31 = vmul.f32 %v3745_v50, %v2603_v0 }
 0xeaf   :  { %v2810_v51 = vpop.permute.xlu0 %2809 }
 0xeb0   :  { %v2812_v38 = vmul.f32 %v3745_v50, %v2810_v51 }
 0xeb2   :  { %2814 = vrot.lane.b32.xlu1 %v2812_v38, %s3774_s3 }
 0xf24   :  { %v2815_v47 = vpop.permute.xlu1 %2814 }
 0xf25   :  { %v2817_v49 = vadd.f32 %v2815_v47, %v2807_v31 }
 0xf27   :  { %3746 = vtanh.f32 %v2817_v49 }
 0xf34   :  { %v3747_v34 = vpop.eup %3746 }
 0xf35   :  { %2820 = vrot.lane.b32.xlu0 %v3747_v34, %s3773_s0 }
 0xfa7   :  { %v2821_v54 = vpop.permute.xlu0 %2820 }
 0xfa8   :  { %v2823_v57 = vmul.f32 %v3745_v50, %v2821_v54 }
 0xfaa   :  { %2836 = vrot.lane.b32.xlu1 %v2823_v57, %s3774_s3 }
0x101c   :  { %v2837_v59 = vpop.permute.xlu1 %2836 }
0x101d   :  { %3653 = vmatmul.mubr.msk.f32.vlgmr.msra.gmra.mxu0 %vm1893_vm3, %v2837_v59 }
0x101e   :  { %3656 = vmatpush3.msra.mxu0 %v2914_v45  ;;  %3663 = vmatprep.mubr.msk.f32.mxu0 %vm3772_vm2, %v5260_v58 }
0x101f   :  { %3657 = vmatprep.subr.mxu0 %v5260_v58 }
0x1020   :  { %3658 = vmatpush3.msra.mxu0 %v2913_v60 }
0x1021   :  { %3659 = vmatprep.subr.mxu0 %v5260_v58 }
0x1022   :  { %3660 = vmatpush3.msra.mxu0 %v2912_v55 }
0x1023   :  { %3661 = vmatprep.subr.mxu0 %v5260_v58 }
0x1024   :  { %3662 = vmatpush3.msra.mxu0 %v2911_v15 }
0x10dd   :  { %v2906_v6 = vpop.f32.mrf.mxu0 }
0x10de   :  { %v2907_v27 = vadd.f32 %v3086_v17, %v2906_v6 }
0x10df   :  { %v3654_v63 = vpop.f32.mrf.mxu0 }
0x10e0   :  { %v2910_v28 = vmax.f32 %v2907_v27, 0.0 }
0x10e2   :  { %3664 = vmatmul.mubr.msk.f32.vlgmr.msra.gmra.mxu0 %vm1893_vm3, %v2910_v28 }
0x11a2   :  { %v2991_v58 = vpop.f32.mrf.mxu0 }
0x11a3   :  { %v2992_v30 = vadd.f32 %v3088_v4, %v2991_v58 }
0x11a4   :  { %v3665_v8 = vpop.f32.mrf.mxu0 }
0x11a5   :  { %2996 = vst.msk [vmem:[#allocation2] sm:$0x3] %vm2995_vm5, %v2992_v30 }
0x11a6   :  { %3759 = shalt.err (!%p3756_p4)
}
0x11a7   :  { %3006 = dma.vmem_to_hbm [thread:$0]  %s3004_s15, 32, %s5245_s10, [#allocation3]  }
0x11a8   :  { %3768 = dma.done.wait [#allocation3], 32  }
0x11a9   :  { %3769 = vsyncadd [#allocation3], 4294967264 }
0x11aa   :  { %3010 = vsyncpa [#allocation3], 1 }

</bundles_post_ra>
